<compile_context>
chip_gen: v5e
topology: v5e:2x2
jax: 0.10.0
libtpu: 0.0.40
codegen_flags: <defaults>
</compile_context>

<pallas_src>
import jax
import jax.numpy as jnp
from jax.experimental import pallas as pl
from jax.experimental.pallas import tpu as pltpu


def make_mlp_kernel(compute_dtype, mxu_layer1):
    def mlp_kernel(xT_ref, w1T_ref, b1_ref, w2_ref, b2_ref, o_ref):
        # xT_ref: (F, TB)   w1T_ref: (H, F)   b1_ref: (H, 1)
        # w2_ref: (1, H)    b2_ref: (1,) in SMEM      o_ref: (1, TB)
        xT = xT_ref[...].astype(compute_dtype)
        w1T = w1T_ref[...].astype(compute_dtype)

        if mxu_layer1:
            # K=2 is degenerate for the MXU, but the MXU/vext slot is otherwise idle.
            h_pre = jnp.dot(w1T, xT, preferred_element_type=jnp.float32)      # (H, TB)
        else:
            # v5e path: tiny-K contraction as VPU outer-product FMAs in f32.
            H, F = w1T_ref.shape
            h_pre = jnp.zeros((H, xT.shape[1]), jnp.float32)
            for f in range(F):                                                # F == 2, static
                h_pre = h_pre + (w1T[:, f:f + 1].astype(jnp.float32)
                                 * xT[f:f + 1, :].astype(jnp.float32))

        h = jnp.maximum(h_pre + b1_ref[...], 0.0)                             # (H, TB) f32

        # Layer 2 on the MXU: (1, H) @ (H, TB) -> lane-dense (1, TB) row.
        y = jnp.dot(w2_ref[...].astype(compute_dtype), h.astype(compute_dtype),
                    preferred_element_type=jnp.float32)
        o_ref[...] = (y + b2_ref[0]).astype(o_ref.dtype)

    return mlp_kernel


def mlp_forward(x, w1, b1, w2, b2, *, block_n=256,
                compute_dtype=jnp.float32, mxu_layer1=True):
    N, F = x.shape
    H = w1.shape[1]

    # Lane-dense batch tiling: block_n a multiple of 128; pad the batch up to it.
    block_n = max(128, (int(block_n) // 128) * 128)
    n_blocks = pl.cdiv(N, block_n)
    N_pad = n_blocks * block_n

    cd = compute_dtype
    xT = jnp.pad(x.astype(cd).T, ((0, 0), (0, N_pad - N)))        # (F, N_pad)
    w1T = w1.T.astype(cd)                                         # (H, F)
    b1_col = b1.reshape(H, 1).astype(jnp.float32)                 # (H, 1)
    w2_row = w2.reshape(1, H).astype(cd)                          # (1, H)
    b2_s = b2.reshape(1).astype(jnp.float32)                      # (1,) -> SMEM scalar

    bytes_accessed = int(xT.size * xT.dtype.itemsize
                         + w1T.size * w1T.dtype.itemsize
                         + b1_col.size * 4
                         + w2_row.size * w2_row.dtype.itemsize
                         + 4
                         + N_pad * x.dtype.itemsize)

    yT = pl.pallas_call(
        make_mlp_kernel(cd, mxu_layer1),
        out_shape=jax.ShapeDtypeStruct((1, N_pad), x.dtype),
        grid_spec=pltpu.PrefetchScalarGridSpec(
            num_scalar_prefetch=0,
            grid=(n_blocks,),
            in_specs=[
                pl.BlockSpec((F, block_n), lambda i: (0, i)),       # xT tile (streamed)
                pl.BlockSpec((H, F), lambda i: (0, 0)),             # w1T (resident)
                pl.BlockSpec((H, 1), lambda i: (0, 0)),             # b1 column (resident)
                pl.BlockSpec((1, H), lambda i: (0, 0)),             # w2 row (resident)
                pl.BlockSpec(memory_space=pltpu.MemorySpace.SMEM),  # b2 scalar in SMEM
            ],
            out_specs=pl.BlockSpec((1, block_n), lambda i: (0, i)),  # lane-dense output row
        ),
        compiler_params=pltpu.CompilerParams(
            dimension_semantics=("parallel",)),                      # shard batch blocks (v7x)
        cost_estimate=pl.CostEstimate(
            flops=2 * N_pad * H * (F + 1),
            transcendentals=0,
            bytes_accessed=bytes_accessed),
    )(xT, w1T, b1_col, w2_row, b2_s)

    return yT[0, :N].reshape(N, 1)


def pick_config():
    """bf16 multiplies + MXU layer-1 on bf16-native TPUs (v6e/v7x); f32 + VPU FMAs otherwise."""
    try:
        kind = jax.devices()[0].device_kind.lower()
    except Exception:
        kind = ""
    if ("v6" in kind) or ("v7" in kind):
        return jnp.bfloat16, True
    return jnp.float32, False


if __name__ == "__main__":
    key = jax.random.PRNGKey(0)
    k_x, k_w1, k_b1, k_w2, k_b2, k_x2 = jax.random.split(key, 6)

    F, H = 2, 512
    bound1 = 1.0 / (F ** 0.5)
    w1 = jax.random.uniform(k_w1, (F, H), jnp.float32, -bound1, bound1)
    b1 = jax.random.uniform(k_b1, (H,), jnp.float32, -bound1, bound1)
    bound2 = 1.0 / (H ** 0.5)
    w2 = jax.random.uniform(k_w2, (H,), jnp.float32, -bound2, bound2)
    b2 = jax.random.uniform(k_b2, (1,), jnp.float32, -bound2, bound2)

    cd, mxu_l1 = pick_config()
    tol = 1e-5 if cd is jnp.float32 else 1e-3

    def reference(xv):
        h = jnp.maximum(jnp.dot(xv.astype(cd), w1.astype(cd),
                                preferred_element_type=jnp.float32) + b1, 0.0)
        return jnp.dot(h.astype(cd), w2.astype(cd).reshape(H, 1),
                       preferred_element_type=jnp.float32) + b2

    # Small batch of 2-feature points (same shape family as the PyTorch module).
    x_small = jax.random.normal(k_x, (8, F), dtype=jnp.float32)
    y_small = jax.block_until_ready(
        mlp_forward(x_small, w1, b1, w2, b2, block_n=256,
                    compute_dtype=cd, mxu_layer1=mxu_l1))
    assert y_small.shape == (8, 1)
    assert jnp.allclose(y_small, reference(x_small), atol=tol, rtol=tol)

    # Larger batch: grid of 4 blocks -> exercises DMA pipelining + megacore sharding.
    x_big = jax.random.normal(k_x2, (1024, F), dtype=jnp.float32)
    y_big = jax.block_until_ready(
        mlp_forward(x_big, w1, b1, w2, b2, block_n=256,
                    compute_dtype=cd, mxu_layer1=mxu_l1))
    assert y_big.shape == (1024, 1)
    assert jnp.allclose(y_big, reference(x_big), atol=tol, rtol=tol)

    print("KERNEL_OK")
</pallas_src>

<mosaic_0001>
module attributes {stable_mosaic.version = 11 : i64} {
  func.func @mlp_kernel(%arg0: i32, %arg1: memref<2x256xf32, #tpu.memory_space<vmem>>, %arg2: memref<512x2xf32, #tpu.memory_space<vmem>>, %arg3: memref<512x1xf32, #tpu.memory_space<vmem>>, %arg4: memref<1x512xf32, #tpu.memory_space<vmem>>, %arg5: memref<1xf32, #tpu.memory_space<smem>>, %arg6: memref<1x256xf32, #tpu.memory_space<vmem>>) attributes {dimension_semantics = [#tpu.dimension_semantics<parallel>], iteration_bounds = array<i64: 1>, scalar_prefetch = 0 : i64, scratch_operands = 0 : i64, tpu.core_type = #tpu.core_type<tc>, window_params = [{transform_indices = @transform_0, window_bounds = array<i64: 2, 256>}, {pipeline_mode = #tpu.pipeline_mode<synchronous>, transform_indices = @transform_1, window_bounds = array<i64: 512, 2>}, {pipeline_mode = #tpu.pipeline_mode<synchronous>, transform_indices = @transform_2, window_bounds = array<i64: 512, 1>}, {pipeline_mode = #tpu.pipeline_mode<synchronous>, transform_indices = @transform_3, window_bounds = array<i64: 1, 512>}, {transform_indices = @transform_4, window_bounds = array<i64: 1>}, {transform_indices = @transform_5, window_bounds = array<i64: 1, 256>}]} {
    %c0 = arith.constant 0 : index
    %c0_0 = arith.constant 0 : index
    %0 = vector.load %arg1[%c0, %c0_0] : memref<2x256xf32, #tpu.memory_space<vmem>>, vector<2x256xf32>
    %c0_1 = arith.constant 0 : index
    %c0_2 = arith.constant 0 : index
    %1 = vector.load %arg2[%c0_1, %c0_2] : memref<512x2xf32, #tpu.memory_space<vmem>>, vector<512x2xf32>
    %cst = arith.constant 0.000000e+00 : f32
    %2 = vector.broadcast %cst : f32 to vector<512x256xf32>
    %3 = vector.extract_strided_slice %1 {offsets = [0, 0], sizes = [512, 1], strides = [1, 1]} : vector<512x2xf32> to vector<512x1xf32>
    %4 = vector.extract_strided_slice %0 {offsets = [0, 0], sizes = [1, 256], strides = [1, 1]} : vector<2x256xf32> to vector<1x256xf32>
    %5 = vector.broadcast %3 : vector<512x1xf32> to vector<512x256xf32>
    %6 = vector.broadcast %4 : vector<1x256xf32> to vector<512x256xf32>
    %7 = arith.mulf %5, %6 : vector<512x256xf32>
    %8 = arith.addf %2, %7 : vector<512x256xf32>
    %9 = vector.extract_strided_slice %1 {offsets = [0, 1], sizes = [512, 1], strides = [1, 1]} : vector<512x2xf32> to vector<512x1xf32>
    %10 = vector.extract_strided_slice %0 {offsets = [1, 0], sizes = [1, 256], strides = [1, 1]} : vector<2x256xf32> to vector<1x256xf32>
    %11 = vector.broadcast %9 : vector<512x1xf32> to vector<512x256xf32>
    %12 = vector.broadcast %10 : vector<1x256xf32> to vector<512x256xf32>
    %13 = arith.mulf %11, %12 : vector<512x256xf32>
    %14 = arith.addf %8, %13 : vector<512x256xf32>
    %c0_3 = arith.constant 0 : index
    %c0_4 = arith.constant 0 : index
    %15 = vector.load %arg3[%c0_3, %c0_4] : memref<512x1xf32, #tpu.memory_space<vmem>>, vector<512x1xf32>
    %16 = vector.broadcast %15 : vector<512x1xf32> to vector<512x256xf32>
    %17 = arith.addf %14, %16 : vector<512x256xf32>
    %cst_5 = arith.constant 0.000000e+00 : f32
    %18 = vector.broadcast %cst_5 : f32 to vector<512x256xf32>
    %19 = arith.maximumf %17, %18 : vector<512x256xf32>
    %c0_6 = arith.constant 0 : index
    %c0_7 = arith.constant 0 : index
    %20 = vector.load %arg4[%c0_6, %c0_7] : memref<1x512xf32, #tpu.memory_space<vmem>>, vector<1x512xf32>
    %cst_8 = arith.constant dense<0.000000e+00> : vector<1x256xf32>
    %21 = tpu.matmul %20, %19, %cst_8 {dimension_numbers = #tpu.dot_dimension_numbers<[1], [0], [0], [1], [0, 0, 1, 1], [], []>} : vector<1x512xf32>, vector<512x256xf32>, vector<1x256xf32> -> vector<1x256xf32>
    %c0_9 = arith.constant 0 : index
    %22 = memref.load %arg5[%c0_9] : memref<1xf32, #tpu.memory_space<smem>>
    %23 = vector.broadcast %22 : f32 to vector<1x256xf32>
    %24 = arith.addf %21, %23 : vector<1x256xf32>
    %c0_10 = arith.constant 0 : index
    %c0_11 = arith.constant 0 : index
    %25 = vector.load %arg6[%c0_10, %c0_11] : memref<1x256xf32, #tpu.memory_space<vmem>>, vector<1x256xf32>
    tpu.vector_store %arg6[%c0_10, %c0_11], %24 {strides = array<i32>} : memref<1x256xf32, #tpu.memory_space<vmem>>, vector<1x256xf32>,
    return
  }
  func.func @transform_0(%arg0: i32) -> (i32, i32) {
    %c0_i32 = arith.constant 0 : i32
    %c0_i32_0 = arith.constant 0 : i32
    return %c0_i32, %arg0 : i32, i32
  }
  func.func @transform_1(%arg0: i32) -> (i32, i32) {
    %c0_i32 = arith.constant 0 : i32
    %c0_i32_0 = arith.constant 0 : i32
    %c0_i32_1 = arith.constant 0 : i32
    return %c0_i32, %c0_i32_0 : i32, i32
  }
  func.func @transform_2(%arg0: i32) -> (i32, i32) {
    %c0_i32 = arith.constant 0 : i32
    %c0_i32_0 = arith.constant 0 : i32
    %c0_i32_1 = arith.constant 0 : i32
    return %c0_i32, %c0_i32_0 : i32, i32
  }
  func.func @transform_3(%arg0: i32) -> (i32, i32) {
    %c0_i32 = arith.constant 0 : i32
    %c0_i32_0 = arith.constant 0 : i32
    %c0_i32_1 = arith.constant 0 : i32
    return %c0_i32, %c0_i32_0 : i32, i32
  }
  func.func @transform_4(%arg0: i32) -> i32 {
    %c0_i32 = arith.constant 0 : i32
    %c0_i32_0 = arith.constant 0 : i32
    return %c0_i32 : i32
  }
  func.func @transform_5(%arg0: i32) -> (i32, i32) {
    %c0_i32 = arith.constant 0 : i32
    %c0_i32_0 = arith.constant 0 : i32
    return %c0_i32, %arg0 : i32, i32
  }
}

</mosaic_0001>

<bundles_post_ra>
// kernel: tpu_custom_call.1
= control target key start
LH: loop header
LB: loop body
LE: loop exit
PB: predicated region body
PF: predicated region fallthrough
CT: control target
= control target key end

     0   :  { %v2064_v2 = vmov 1   ;;  %v3631_v3 = vmov 0   ;;  %s3625_s0 = inlined_call_operand.vmem [shape: f32[2,256], index: 0, kind: input, shape index: {}]   ;;  %s3626_s1 = inlined_call_operand.vmem [shape: f32[512,2], index: 1, kind: input, shape index: {}]   ;;  %s3627_s2 = inlined_call_operand.vmem [shape: f32[512,1], index: 2, kind: input, shape index: {}]   ;;  %s3628_s3 = inlined_call_operand.vmem [shape: f32[1,512], index: 3, kind: input, shape index: {}]   ;;  %s3629_s4 = inlined_call_operand.<no memory space> [shape: f32[1], index: 4, kind: input, shape index: {}]   ;;  %s3630_s5 = inlined_call_operand.hbm [shape: f32[1,256], index: 5, kind: output, shape index: {}]  }
   0x1   :  { %v2100_v0 = vld [vmem:[%s3626_s1 + $0x20] sm:$0xff]  ;;  %v25_v1 = vld [vmem:[%s3626_s1 + $0x10] sm:$0xff]  ;;  %2034 = vset.pattern.permute.xlu0 %v2064_v2  ;;  %2031 = vset.pattern.permute.xlu2 %v3631_v3 }
   0x2   :  { %2030 = vset.pattern.permute.xlu1 %v3631_v3  ;;  %109 = vperm.xlu2 %2031, %v2100_v0  }
   0x3   :  { %679 = vperm.xlu0 %2034, %v25_v1   ;;  %99 = vperm.xlu1 %2030, %v25_v1  }
   0x4   :  { %11 = vsyncpa [#allocation4], 0  ;;  %v2112_v4 = vld [vmem:[%s3626_s1 + $0x28] sm:$0xff]  ;;  %v30_v5 = vld [vmem:[%s3626_s1 + $0x38] sm:$0xff]  ;;  %s2066_s17 = smov [#allocation3]   ;;  %s2018_s21 = sshll.u32 %s3630_s5, 4  ;;  %s2019_s21 = int_to_ptr.hbm [resolvable:$true] %s2018_s21 }
   0x5   :  { %v2120_v6 = vld [vmem:[%s3626_s1 + $0x18] sm:$0xff]  ;;  %v2127_v7 = vld [vmem:[%s3626_s1 + $0x40] sm:$0xff]  ;;  %v33_v8 = vld [vmem:[%s3626_s1 + $0x50] sm:$0xff]  ;;  %s2016_s18 = sshll.u32 %s2066_s17, 4  ;;  %vm2003_vm0 = vcmask 1040384   ;;  %s2017_s18 = int_to_ptr.vmem [resolvable:$true] %s2016_s18 }
   0x6   :  { %v2136_v9 = vld [vmem:[%s3626_s1 + $0x58] sm:$0xff]  ;;  %v36_v10 = vld [vmem:[%s3626_s1 + $0x68] sm:$0xff]  ;;  %v2145_v11 = vld [vmem:[%s3626_s1 + $0x70] sm:$0xff] }
   0x7   :  { %v39_v12 = vld [vmem:[%s3626_s1 + $0x80] sm:$0xff]  ;;  %v2154_v13 = vld [vmem:[%s3626_s1 + $0x88] sm:$0xff]  ;;  %v42_v14 = vld [vmem:[%s3626_s1 + $0x98] sm:$0xff] }
   0x8   :  { %v2163_v15 = vld [vmem:[%s3626_s1 + $0xa0] sm:$0xff]  ;;  %v45_v16 = vld [vmem:[%s3626_s1 + $0xb0] sm:$0xff]  ;;  %v2172_v17 = vld [vmem:[%s3626_s1 + $0xb8] sm:$0xff] }
   0x9   :  { %v48_v18 = vld [vmem:[%s3626_s1 + $0xc8] sm:$0xff]  ;;  %v2181_v19 = vld [vmem:[%s3626_s1 + $0xd0] sm:$0xff]  ;;  %v51_v20 = vld [vmem:[%s3626_s1 + $0xe0] sm:$0xff] }
   0xa   :  { %114 = vperm.xlu2 %2031, %v2112_v4   ;;  %v2190_v21 = vld [vmem:[%s3626_s1 + $0xe8] sm:$0xff]  ;;  %v54_v22 = vld [vmem:[%s3626_s1 + $0xf8] sm:$0xff]  ;;  %v2199_v23 = vld [vmem:[%s3626_s1 + $0x100] sm:$0xff] }
   0xb   :  { %699 = vperm.xlu0 %2034, %v30_v5   ;;  %104 = vperm.xlu1 %2030, %v2120_v6   ;;  %v57_v24 = vld [vmem:[%s3626_s1 + $0x110] sm:$0xff]  ;;  %v2208_v25 = vld [vmem:[%s3626_s1 + $0x118] sm:$0xff]  ;;  %v60_v26 = vld [vmem:[%s3626_s1 + $0x128] sm:$0xff] }
   0xc   :  { %v2219_v28 = vld [vmem:[%s3626_s1 + $0x130] sm:$0xff]  ;;  %v63_v29 = vld [vmem:[%s3626_s1 + $0x140] sm:$0xff]  ;;  %v2230_v31 = vld [vmem:[%s3626_s1 + $0x148] sm:$0xff] }
   0xd   :  { %v66_v32 = vld [vmem:[%s3626_s1 + $0x158] sm:$0xff]  ;;  %v2241_v34 = vld [vmem:[%s3626_s1 + $0x160] sm:$0xff]  ;;  %v69_v35 = vld [vmem:[%s3626_s1 + $0x170] sm:$0xff] }
   0xe   :  { %v2256_v39 = vld [vmem:[%s3626_s1 + $0x178] sm:$0xff]  ;;  %v72_v40 = vld [vmem:[%s3626_s1 + $0x188] sm:$0xff]  ;;  %v2271_v44 = vld [vmem:[%s3626_s1 + $0x190] sm:$0xff] }
   0xf   :  { %v75_v45 = vld [vmem:[%s3626_s1 + $0x1a0] sm:$0xff]  ;;  %v2286_v49 = vld [vmem:[%s3626_s1 + $0x1a8] sm:$0xff]  ;;  %v78_v50 = vld [vmem:[%s3626_s1 + $0x1b8] sm:$0xff] }
  0x10   :  { %v2301_v54 = vld [vmem:[%s3626_s1 + $0x1c0] sm:$0xff]  ;;  %v81_v55 = vld [vmem:[%s3626_s1 + $0x1d0] sm:$0xff]  ;;  %v2316_v59 = vld [vmem:[%s3626_s1 + $0x1d8] sm:$0xff] }
  0x11   :  { %v84_v60 = vld [vmem:[%s3626_s1 + $0x1e8] sm:$0xff]  ;;  %v2331_v1 = vld [vmem:[%s3626_s1 + $0x1f0] sm:$0xff] }
  0x12   :  { %129 = vperm.xlu2 %2031, %v2127_v7  }
  0x13   :  { %711 = vperm.xlu0 %2034, %v33_v8   ;;  %124 = vperm.xlu1 %2030, %v30_v5   ;;  %v23_v5 = vld [vmem:[%s3626_s1] sm:$0xff] }
  0x1a   :  { %144 = vperm.xlu2 %2031, %v2136_v9  }
  0x1b   :  { %723 = vperm.xlu0 %2034, %v36_v10   ;;  %139 = vperm.xlu1 %2030, %v33_v8  }
  0x22   :  { %159 = vperm.xlu2 %2031, %v2145_v11  }
  0x23   :  { %735 = vperm.xlu0 %2034, %v39_v12   ;;  %154 = vperm.xlu1 %2030, %v36_v10  }
  0x2a   :  { %174 = vperm.xlu2 %2031, %v2154_v13  }
  0x2b   :  { %747 = vperm.xlu0 %2034, %v42_v14   ;;  %169 = vperm.xlu1 %2030, %v39_v12  }
  0x32   :  { %189 = vperm.xlu2 %2031, %v2163_v15  }
  0x33   :  { %759 = vperm.xlu0 %2034, %v45_v16   ;;  %184 = vperm.xlu1 %2030, %v42_v14   ;;  %v24_v14 = vld [vmem:[%s3626_s1 + $0x8] sm:$0xff] }
  0x3a   :  { %204 = vperm.xlu2 %2031, %v2172_v17  }
  0x3b   :  { %771 = vperm.xlu0 %2034, %v48_v18   ;;  %199 = vperm.xlu1 %2030, %v45_v16  }
  0x42   :  { %219 = vperm.xlu2 %2031, %v2181_v19  }
  0x43   :  { %783 = vperm.xlu0 %2034, %v51_v20   ;;  %214 = vperm.xlu1 %2030, %v48_v18  }
  0x4a   :  { %234 = vperm.xlu2 %2031, %v2190_v21  }
  0x4b   :  { %795 = vperm.xlu0 %2034, %v54_v22   ;;  %229 = vperm.xlu1 %2030, %v51_v20  }
  0x52   :  { %249 = vperm.xlu2 %2031, %v2199_v23  }
  0x53   :  { %807 = vperm.xlu0 %2034, %v57_v24   ;;  %244 = vperm.xlu1 %2030, %v54_v22   ;;  %v29_v22 = vld [vmem:[%s3626_s1 + $0x30] sm:$0xff] }
  0x5a   :  { %264 = vperm.xlu2 %2031, %v2208_v25  }
  0x5b   :  { %819 = vperm.xlu0 %2034, %v60_v26   ;;  %259 = vperm.xlu1 %2030, %v57_v24  }
  0x5c   :  { %v2214_v27 = vpop.permute.xlu2 %109 }
  0x62   :  { %279 = vperm.xlu2 %2031, %v2219_v28  }
  0x63   :  { %831 = vperm.xlu0 %2034, %v63_v29   ;;  %274 = vperm.xlu1 %2030, %v60_v26  }
  0x64   :  { %v2225_v30 = vpop.permute.xlu2 %114 }
  0x6a   :  { %294 = vperm.xlu2 %2031, %v2230_v31  }
  0x6b   :  { %843 = vperm.xlu0 %2034, %v66_v32   ;;  %289 = vperm.xlu1 %2030, %v63_v29   ;;  %v32_v29 = vld [vmem:[%s3626_s1 + $0x48] sm:$0xff] }
  0x6c   :  { %v2236_v33 = vpop.permute.xlu2 %129 }
  0x72   :  { %309 = vperm.xlu2 %2031, %v2241_v34  }
  0x73   :  { %855 = vperm.xlu0 %2034, %v69_v35   ;;  %304 = vperm.xlu1 %2030, %v66_v32  }
  0x74   :  { %v2247_v36 = vpop.permute.xlu2 %144 }
  0x75   :  { %v2249_v37 = vpop.permute.xlu0 %679  ;;  %v2251_v38 = vpop.permute.xlu1 %99 }
  0x76   :  { %3678 = vst [vmem:[#allocation6_spill] sm:$0xff] %v2249_v37 }
  0x77   :  { %3679 = vst [vmem:[#allocation7_spill] sm:$0xff] %v2251_v38 }
  0x7a   :  { %324 = vperm.xlu2 %2031, %v2256_v39  }
  0x7b   :  { %867 = vperm.xlu0 %2034, %v72_v40   ;;  %319 = vperm.xlu1 %2030, %v69_v35  }
  0x7c   :  { %v2262_v41 = vpop.permute.xlu2 %159 }
  0x7d   :  { %3680 = vst [vmem:[#allocation8_spill] sm:$0xff] %v2262_v41  ;;  %v2264_v42 = vpop.permute.xlu0 %699  ;;  %v2266_v43 = vpop.permute.xlu1 %104 }
  0x82   :  { %339 = vperm.xlu2 %2031, %v2271_v44  }
  0x83   :  { %879 = vperm.xlu0 %2034, %v75_v45   ;;  %334 = vperm.xlu1 %2030, %v72_v40  }
  0x84   :  { %v2277_v46 = vpop.permute.xlu2 %174 }
  0x85   :  { %v2279_v47 = vpop.permute.xlu0 %711  ;;  %v2281_v48 = vpop.permute.xlu1 %124 }
  0x8a   :  { %354 = vperm.xlu2 %2031, %v2286_v49  }
  0x8b   :  { %891 = vperm.xlu0 %2034, %v78_v50   ;;  %349 = vperm.xlu1 %2030, %v75_v45  }
  0x8c   :  { %v2292_v51 = vpop.permute.xlu2 %189 }
  0x8d   :  { %v2294_v52 = vpop.permute.xlu0 %723  ;;  %v2296_v53 = vpop.permute.xlu1 %139 }
  0x92   :  { %369 = vperm.xlu2 %2031, %v2301_v54  }
  0x93   :  { %903 = vperm.xlu0 %2034, %v81_v55   ;;  %364 = vperm.xlu1 %2030, %v78_v50  }
  0x94   :  { %v2307_v56 = vpop.permute.xlu2 %204 }
  0x95   :  { %v2309_v57 = vpop.permute.xlu0 %735  ;;  %v2311_v58 = vpop.permute.xlu1 %154 }
  0x96   :  { %3681 = vst [vmem:[#allocation9_spill] sm:$0xff] %v2309_v57 }
  0x9a   :  { %384 = vperm.xlu2 %2031, %v2316_v59  }
  0x9b   :  { %915 = vperm.xlu0 %2034, %v84_v60   ;;  %379 = vperm.xlu1 %2030, %v81_v55  }
  0x9c   :  { %v2322_v61 = vpop.permute.xlu2 %219 }
  0x9d   :  { %3682 = vst [vmem:[#allocation10_spill] sm:$0xff] %v2322_v61  ;;  %v2324_v62 = vpop.permute.xlu0 %747  ;;  %v2326_v63 = vpop.permute.xlu1 %169 }
  0x9e   :  { %3683 = vst [vmem:[#allocation11_spill] sm:$0xff] %v2324_v62 }
  0x9f   :  { %3684 = vst [vmem:[#allocation12_spill] sm:$0xff] %v2326_v63 }
  0xa2   :  { %399 = vperm.xlu2 %2031, %v2331_v1  }
  0xa3   :  { %2035 = vset.pattern.permute.xlu0 %v3631_v3  ;;  %394 = vperm.xlu1 %2030, %v84_v60  }
  0xa4   :  { %89 = vperm.xlu0 %2035, %v23_v5   ;;  %v2338_v8 = vpop.permute.xlu2 %234 }
  0xa5   :  { %3685 = vst [vmem:[#allocation13_spill] sm:$0xff] %v2338_v8  ;;  %v2340_v10 = vpop.permute.xlu0 %759  ;;  %v2342_v12 = vpop.permute.xlu1 %184 }
  0xa6   :  { %3686 = vst [vmem:[#allocation14_spill] sm:$0xff] %v2340_v10 }
  0xa7   :  { %3687 = vst [vmem:[#allocation15_spill] sm:$0xff] %v2342_v12 }
  0xaa   :  { %2033 = vset.pattern.permute.xlu2 %v2064_v2 }
  0xab   :  { %2032 = vset.pattern.permute.xlu1 %v2064_v2  ;;  %675 = vperm.xlu2 %2033, %v24_v14  }
  0xac   :  { %94 = vperm.xlu0 %2035, %v24_v14   ;;  %671 = vperm.xlu1 %2032, %v23_v5   ;;  %v2349_v16 = vpop.permute.xlu2 %249 }
  0xad   :  { %3688 = vst [vmem:[#allocation16_spill] sm:$0xff] %v2349_v16  ;;  %v2351_v18 = vpop.permute.xlu0 %771  ;;  %v2353_v20 = vpop.permute.xlu1 %199 }
  0xae   :  { %3689 = vst [vmem:[#allocation17_spill] sm:$0xff] %v2351_v18 }
  0xaf   :  { %3690 = vst [vmem:[#allocation18_spill] sm:$0xff] %v2353_v20 }
  0xb3   :  { %687 = vperm.xlu2 %2033, %v2100_v0  }
  0xb4   :  { %119 = vperm.xlu0 %2035, %v29_v22   ;;  %683 = vperm.xlu1 %2032, %v2120_v6   ;;  %v2360_v24 = vpop.permute.xlu2 %264  ;;  %v35_v6 = vld [vmem:[%s3626_s1 + $0x60] sm:$0xff] }
  0xb5   :  { %3691 = vst [vmem:[#allocation19_spill] sm:$0xff] %v2360_v24  ;;  %v2362_v2 = vpop.permute.xlu0 %783  ;;  %v2364_v26 = vpop.permute.xlu1 %214 }
  0xb6   :  { %3692 = vst [vmem:[#allocation20_spill] sm:$0xff] %v2362_v2 }
  0xb7   :  { %3693 = vst [vmem:[#allocation21_spill] sm:$0xff] %v2364_v26 }
  0xbb   :  { %695 = vperm.xlu2 %2033, %v29_v22  }
  0xbc   :  { %134 = vperm.xlu0 %2035, %v32_v29   ;;  %691 = vperm.xlu1 %2032, %v2112_v4   ;;  %v2370_v32 = vpop.permute.xlu2 %279  ;;  %v38_v4 = vld [vmem:[%s3626_s1 + $0x78] sm:$0xff] }
  0xbd   :  { %3694 = vst [vmem:[#allocation22_spill] sm:$0xff] %v2370_v32  ;;  %v2372_v0 = vpop.permute.xlu0 %795  ;;  %v2374_v35 = vpop.permute.xlu1 %229 }
  0xbe   :  { %3695 = vst [vmem:[#allocation23_spill] sm:$0xff] %v2372_v0 }
  0xbf   :  { %3696 = vst [vmem:[#allocation24_spill] sm:$0xff] %v2374_v35 }
  0xc3   :  { %707 = vperm.xlu2 %2033, %v32_v29  }
  0xc4   :  { %149 = vperm.xlu0 %2035, %v35_v6   ;;  %703 = vperm.xlu1 %2032, %v2127_v7   ;;  %v2380_v40 = vpop.permute.xlu2 %294  ;;  %v41_v7 = vld [vmem:[%s3626_s1 + $0x90] sm:$0xff] }
  0xc5   :  { %3697 = vst [vmem:[#allocation25_spill] sm:$0xff] %v2380_v40  ;;  %v2382_v45 = vpop.permute.xlu0 %807  ;;  %v2384_v50 = vpop.permute.xlu1 %244 }
  0xc6   :  { %3698 = vst [vmem:[#allocation26_spill] sm:$0xff] %v2382_v45 }
  0xc7   :  { %3699 = vst [vmem:[#allocation27_spill] sm:$0xff] %v2384_v50 }
  0xcb   :  { %719 = vperm.xlu2 %2033, %v35_v6  }
  0xcc   :  { %164 = vperm.xlu0 %2035, %v38_v4   ;;  %715 = vperm.xlu1 %2032, %v2136_v9   ;;  %v2390_v55 = vpop.permute.xlu2 %309  ;;  %v44_v9 = vld [vmem:[%s3626_s1 + $0xa8] sm:$0xff] }
  0xcd   :  { %3700 = vst [vmem:[#allocation28_spill] sm:$0xff] %v2390_v55  ;;  %v2392_v60 = vpop.permute.xlu0 %819  ;;  %v2394_v5 = vpop.permute.xlu1 %259 }
  0xce   :  { %3701 = vst [vmem:[#allocation29_spill] sm:$0xff] %v2392_v60 }
  0xcf   :  { %3702 = vst [vmem:[#allocation30_spill] sm:$0xff] %v2394_v5 }
  0xd3   :  { %731 = vperm.xlu2 %2033, %v38_v4  }
  0xd4   :  { %179 = vperm.xlu0 %2035, %v41_v7   ;;  %727 = vperm.xlu1 %2032, %v2145_v11   ;;  %v2400_v14 = vpop.permute.xlu2 %324  ;;  %v47_v11 = vld [vmem:[%s3626_s1 + $0xc0] sm:$0xff] }
  0xd5   :  { %v2402_v22 = vpop.permute.xlu0 %831  ;;  %v2404_v29 = vpop.permute.xlu1 %274 }
  0xd6   :  { %3703 = vst [vmem:[#allocation31_spill] sm:$0xff] %v2402_v22 }
  0xd7   :  { %3704 = vst [vmem:[#allocation32_spill] sm:$0xff] %v2404_v29 }
  0xdb   :  { %743 = vperm.xlu2 %2033, %v41_v7  }
  0xdc   :  { %194 = vperm.xlu0 %2035, %v44_v9   ;;  %739 = vperm.xlu1 %2032, %v2154_v13   ;;  %v2410_v6 = vpop.permute.xlu2 %339  ;;  %v50_v13 = vld [vmem:[%s3626_s1 + $0xd8] sm:$0xff] }
  0xdd   :  { %v2412_v4 = vpop.permute.xlu0 %843  ;;  %v2414_v3 = vpop.permute.xlu1 %289 }
  0xde   :  { %3705 = vst [vmem:[#allocation33_spill] sm:$0xff] %v2412_v4 }
  0xdf   :  { %3706 = vst [vmem:[#allocation34_spill] sm:$0xff] %v2414_v3 }
  0xe3   :  { %755 = vperm.xlu2 %2033, %v44_v9  }
  0xe4   :  { %209 = vperm.xlu0 %2035, %v47_v11   ;;  %751 = vperm.xlu1 %2032, %v2163_v15   ;;  %v2420_v16 = vpop.permute.xlu2 %354  ;;  %v22_v15 = vld [vmem:[%s3625_s0] sm:$0xf] }
  0xe5   :  { %v2422_v7 = vpop.permute.xlu0 %855  ;;  %v2424_v45 = vpop.permute.xlu1 %304  ;;  %v408_v60 = vperm.slane %v22_v15, 0  ;;  %v409_v29 = vperm.slane %v22_v15, 2  ;;  %v926_v57 = vperm.slane %v22_v15, 1  ;;  %v927_v63 = vperm.slane %v22_v15, 3 }
  0xe6   :  { %3707 = vst [vmem:[#allocation35_spill] sm:$0xff] %v2424_v45 }
  0xe7   :  { %v2440_v62 = vperm.slane %v408_v60, 0  ;;  %v2444_v32 = vperm.slane %v926_v57, 1  ;;  %v2446_v12 = vperm.slane %v927_v63, 1 }
  0xeb   :  { %767 = vperm.xlu2 %2033, %v47_v11   ;;  %v53_v11 = vld [vmem:[%s3626_s1 + $0xf0] sm:$0xff] }
  0xec   :  { %224 = vperm.xlu0 %2035, %v50_v13   ;;  %763 = vperm.xlu1 %2032, %v2172_v17   ;;  %v2430_v5 = vpop.permute.xlu2 %369  ;;  %v2442_v17 = vperm.slane %v409_v29, 0 }
  0xed   :  { %v868_v9 = vpop.permute.xlu0 %867  ;;  %v2435_v24 = vpop.permute.xlu1 %319 }
  0xee   :  { %v1030_v3 = vmul.f32 %v2444_v32, %v868_v9  ;;  %v1031_v20 = vmul.f32 %v2446_v12, %v868_v9 }
  0xf3   :  { %779 = vperm.xlu2 %2033, %v50_v13  }
  0xf4   :  { %239 = vperm.xlu0 %2035, %v53_v11   ;;  %775 = vperm.xlu1 %2032, %v2181_v19   ;;  %v2449_v22 = vpop.permute.xlu2 %384  ;;  %v56_v19 = vld [vmem:[%s3626_s1 + $0x108] sm:$0xff] }
  0xf5   :  { %v880_v10 = vpop.permute.xlu0 %879  ;;  %v335_v15 = vpop.permute.xlu1 %334 }
  0xf6   :  { %v512_v60 = vmul.f32 %v2440_v62, %v335_v15  ;;  %v513_v29 = vmul.f32 %v2442_v17, %v335_v15  ;;  %v1036_v26 = vmul.f32 %v2444_v32, %v880_v10  ;;  %v1037_v15 = vmul.f32 %v2446_v12, %v880_v10 }
  0xf8   :  { %v2455_v13 = vadd.f32 %v1030_v3, %v512_v60  ;;  %v2457_v57 = vadd.f32 %v1031_v20, %v513_v29 }
  0xfa   :  { %3708 = vst [vmem:[#allocation36_spill] sm:$0xff] %v2455_v13 }
  0xfb   :  { %3709 = vst [vmem:[#allocation37_spill] sm:$0xff] %v2457_v57  ;;  %791 = vperm.xlu2 %2033, %v53_v11  }
  0xfc   :  { %254 = vperm.xlu0 %2035, %v56_v19   ;;  %787 = vperm.xlu1 %2032, %v2190_v21   ;;  %v2463_v63 = vpop.permute.xlu2 %399  ;;  %v59_v21 = vld [vmem:[%s3626_s1 + $0x120] sm:$0xff] }
  0xfd   :  { %v892_v18 = vpop.permute.xlu0 %891  ;;  %v350_v9 = vpop.permute.xlu1 %349 }
  0xfe   :  { %v518_v3 = vmul.f32 %v2440_v62, %v350_v9  ;;  %v519_v20 = vmul.f32 %v2442_v17, %v350_v9  ;;  %v1042_v10 = vmul.f32 %v2444_v32, %v892_v18  ;;  %v1043_v13 = vmul.f32 %v2446_v12, %v892_v18 }
 0x100   :  { %v2469_v60 = vadd.f32 %v1036_v26, %v518_v3  ;;  %v2471_v29 = vadd.f32 %v1037_v15, %v519_v20 }
 0x102   :  { %3710 = vst [vmem:[#allocation38_spill] sm:$0xff] %v2469_v60 }
 0x103   :  { %3711 = vst [vmem:[#allocation39_spill] sm:$0xff] %v2471_v29  ;;  %803 = vperm.xlu2 %2033, %v56_v19   ;;  %v62_v19 = vld [vmem:[%s3626_s1 + $0x138] sm:$0xff] }
 0x104   :  { %269 = vperm.xlu0 %2035, %v59_v21   ;;  %799 = vperm.xlu1 %2032, %v2199_v23  }
 0x105   :  { %v904_v11 = vpop.permute.xlu0 %903  ;;  %v365_v57 = vpop.permute.xlu1 %364 }
 0x106   :  { %v524_v9 = vmul.f32 %v2440_v62, %v365_v57  ;;  %v525_v26 = vmul.f32 %v2442_v17, %v365_v57  ;;  %v676_v15 = vpop.permute.xlu2 %675  ;;  %v1048_v18 = vmul.f32 %v2444_v32, %v904_v11  ;;  %v1049_v60 = vmul.f32 %v2446_v12, %v904_v11 }
 0x108   :  { %v2481_v3 = vadd.f32 %v1042_v10, %v524_v9  ;;  %v2483_v20 = vadd.f32 %v1043_v13, %v525_v26 }
 0x10a   :  { %3712 = vst [vmem:[#allocation40_spill] sm:$0xff] %v2481_v3 }
 0x10b   :  { %3713 = vst [vmem:[#allocation41_spill] sm:$0xff] %v2483_v20  ;;  %815 = vperm.xlu2 %2033, %v59_v21  }
 0x10c   :  { %284 = vperm.xlu0 %2035, %v62_v19   ;;  %811 = vperm.xlu1 %2032, %v2208_v25   ;;  %v65_v25 = vld [vmem:[%s3626_s1 + $0x150] sm:$0xff] }
 0x10d   :  { %v916_v23 = vpop.permute.xlu0 %915  ;;  %v380_v29 = vpop.permute.xlu1 %379 }
 0x10e   :  { %v530_v57 = vmul.f32 %v2440_v62, %v380_v29  ;;  %v531_v10 = vmul.f32 %v2442_v17, %v380_v29  ;;  %v2493_v13 = vpop.permute.xlu2 %687  ;;  %v1054_v11 = vmul.f32 %v2444_v32, %v916_v23  ;;  %v1055_v20 = vmul.f32 %v2446_v12, %v916_v23 }
 0x10f   :  { %v935_v23 = vmul.f32 %v2446_v12, %v676_v15 }
 0x110   :  { %v2495_v9 = vadd.f32 %v1048_v18, %v530_v57  ;;  %v2497_v26 = vadd.f32 %v1049_v60, %v531_v10 }
 0x112   :  { %3714 = vst [vmem:[#allocation42_spill] sm:$0xff] %v2495_v9 }
 0x113   :  { %3715 = vst [vmem:[#allocation43_spill] sm:$0xff] %v2497_v26  ;;  %827 = vperm.xlu2 %2033, %v62_v19   ;;  %v68_v19 = vld [vmem:[%s3626_s1 + $0x168] sm:$0xff] }
 0x114   :  { %299 = vperm.xlu0 %2035, %v65_v25   ;;  %823 = vperm.xlu1 %2032, %v2219_v28   ;;  %v934_v28 = vmul.f32 %v2444_v32, %v676_v15 }
 0x115   :  { %v395_v21 = vpop.permute.xlu1 %394 }
 0x116   :  { %v536_v29 = vmul.f32 %v2440_v62, %v395_v21  ;;  %v537_v18 = vmul.f32 %v2442_v17, %v395_v21  ;;  %v696_v57 = vpop.permute.xlu2 %695  ;;  %v90_v60 = vpop.permute.xlu0 %89 }
 0x117   :  { %v414_v21 = vmul.f32 %v2440_v62, %v90_v60  ;;  %v415_v26 = vmul.f32 %v2442_v17, %v90_v60 }
 0x118   :  { %v2507_v10 = vadd.f32 %v1054_v11, %v536_v29  ;;  %v2509_v3 = vadd.f32 %v1055_v20, %v537_v18 }
 0x11a   :  { %3716 = vst [vmem:[#allocation44_spill] sm:$0xff] %v2507_v10 }
 0x11b   :  { %3717 = vst [vmem:[#allocation45_spill] sm:$0xff] %v2509_v3  ;;  %839 = vperm.xlu2 %2033, %v65_v25   ;;  %v945_v3 = vmul.f32 %v2446_v12, %v696_v57 }
 0x11c   :  { %314 = vperm.xlu0 %2035, %v68_v19   ;;  %835 = vperm.xlu1 %2032, %v2230_v31   ;;  %v71_v31 = vld [vmem:[%s3626_s1 + $0x180] sm:$0xff] }
 0x11e   :  { %v708_v11 = vpop.permute.xlu2 %707  ;;  %v95_v29 = vpop.permute.xlu0 %94 }
 0x11f   :  { %v416_v20 = vmul.f32 %v2440_v62, %v95_v29  ;;  %v417_v18 = vmul.f32 %v2442_v17, %v95_v29  ;;  %v672_v9 = vpop.permute.xlu1 %671 }
 0x120   :  { %v932_v25 = vmul.f32 %v2444_v32, %v672_v9  ;;  %v933_v2 = vmul.f32 %v2446_v12, %v672_v9  ;;  %v944_v9 = vmul.f32 %v2444_v32, %v696_v57 }
 0x121   :  { %v2526_v15 = vadd.f32 %v934_v28, %v416_v20  ;;  %v2528_v35 = vadd.f32 %v935_v23, %v417_v18 }
 0x122   :  { %v2530_v60 = vadd.f32 %v932_v25, %v414_v21  ;;  %v2532_v8 = vadd.f32 %v933_v2, %v415_v26  ;;  %v74_v2 = vld [vmem:[%s3626_s1 + $0x198] sm:$0xff]  ;;  %v950_v21 = vmul.f32 %v2444_v32, %v708_v11 }
 0x123   :  { %851 = vperm.xlu2 %2033, %v68_v19  }
 0x124   :  { %329 = vperm.xlu0 %2035, %v71_v31   ;;  %847 = vperm.xlu1 %2032, %v2241_v34  }
 0x126   :  { %v720_v29 = vpop.permute.xlu2 %719  ;;  %v120_v40 = vpop.permute.xlu0 %119 }
 0x127   :  { %v426_v10 = vmul.f32 %v2440_v62, %v120_v40  ;;  %v427_v28 = vmul.f32 %v2442_v17, %v120_v40  ;;  %v2539_v23 = vpop.permute.xlu1 %683  ;;  %v951_v40 = vmul.f32 %v2446_v12, %v708_v11 }
 0x129   :  { %v2544_v26 = vadd.f32 %v944_v9, %v426_v10  ;;  %v2546_v19 = vadd.f32 %v945_v3, %v427_v28  ;;  %v77_v3 = vld [vmem:[%s3626_s1 + $0x1b0] sm:$0xff]  ;;  %v956_v9 = vmul.f32 %v2444_v32, %v720_v29  ;;  %v957_v28 = vmul.f32 %v2446_v12, %v720_v29 }
 0x12b   :  { %3718 = vst [vmem:[#allocation46_spill] sm:$0xff] %v2544_v26  ;;  %863 = vperm.xlu2 %2033, %v71_v31  }
 0x12c   :  { %344 = vperm.xlu0 %2035, %v74_v2   ;;  %859 = vperm.xlu1 %2032, %v2256_v39  }
 0x12e   :  { %v732_v34 = vpop.permute.xlu2 %731  ;;  %v135_v57 = vpop.permute.xlu0 %134 }
 0x12f   :  { %v432_v20 = vmul.f32 %v2440_v62, %v135_v57  ;;  %v433_v18 = vmul.f32 %v2442_v17, %v135_v57  ;;  %v2553_v25 = vpop.permute.xlu1 %691 }
 0x131   :  { %v2558_v10 = vadd.f32 %v950_v21, %v432_v20  ;;  %v2560_v31 = vadd.f32 %v951_v40, %v433_v18  ;;  %v80_v21 = vld [vmem:[%s3626_s1 + $0x1c8] sm:$0xff]  ;;  %v962_v20 = vmul.f32 %v2444_v32, %v732_v34  ;;  %v963_v18 = vmul.f32 %v2446_v12, %v732_v34 }
 0x133   :  { %3719 = vst [vmem:[#allocation47_spill] sm:$0xff] %v2560_v31  ;;  %875 = vperm.xlu2 %2033, %v74_v2  }
 0x134   :  { %359 = vperm.xlu0 %2035, %v77_v3   ;;  %871 = vperm.xlu1 %2032, %v2271_v44  }
 0x136   :  { %v744_v39 = vpop.permute.xlu2 %743  ;;  %v150_v11 = vpop.permute.xlu0 %149 }
 0x137   :  { %v438_v57 = vmul.f32 %v2440_v62, %v150_v11  ;;  %v439_v0 = vmul.f32 %v2442_v17, %v150_v11  ;;  %v2567_v4 = vpop.permute.xlu1 %703 }
 0x139   :  { %v2572_v2 = vadd.f32 %v956_v9, %v438_v57  ;;  %v2574_v40 = vadd.f32 %v957_v28, %v439_v0  ;;  %v83_v0 = vld [vmem:[%s3626_s1 + $0x1e0] sm:$0xff]  ;;  %v968_v28 = vmul.f32 %v2444_v32, %v744_v39  ;;  %v969_v57 = vmul.f32 %v2446_v12, %v744_v39 }
 0x13b   :  { %3720 = vst [vmem:[#allocation48_spill] sm:$0xff] %v2574_v40  ;;  %887 = vperm.xlu2 %2033, %v77_v3  }
 0x13c   :  { %374 = vperm.xlu0 %2035, %v80_v21   ;;  %883 = vperm.xlu1 %2032, %v2286_v49  }
 0x13e   :  { %v756_v44 = vpop.permute.xlu2 %755  ;;  %v165_v29 = vpop.permute.xlu0 %164 }
 0x13f   :  { %v444_v11 = vmul.f32 %v2440_v62, %v165_v29  ;;  %v445_v31 = vmul.f32 %v2442_v17, %v165_v29  ;;  %v2581_v50 = vpop.permute.xlu1 %715 }
 0x141   :  { %v2586_v3 = vadd.f32 %v963_v18, %v445_v31  ;;  %v2588_v9 = vadd.f32 %v962_v20, %v444_v11  ;;  %v86_v31 = vld [vmem:[%s3626_s1 + $0x1f8] sm:$0xff]  ;;  %v974_v18 = vmul.f32 %v2444_v32, %v756_v44  ;;  %v975_v11 = vmul.f32 %v2446_v12, %v756_v44 }
 0x143   :  { %3721 = vst [vmem:[#allocation49_spill] sm:$0xff] %v2586_v3  ;;  %899 = vperm.xlu2 %2033, %v80_v21  }
 0x144   :  { %389 = vperm.xlu0 %2035, %v83_v0   ;;  %895 = vperm.xlu1 %2032, %v2301_v54  }
 0x146   :  { %v768_v49 = vpop.permute.xlu2 %767  ;;  %v180_v34 = vpop.permute.xlu0 %179 }
 0x147   :  { %v450_v29 = vmul.f32 %v2440_v62, %v180_v34  ;;  %v451_v40 = vmul.f32 %v2442_v17, %v180_v34  ;;  %v2595_v45 = vpop.permute.xlu1 %727 }
 0x149   :  { %v2600_v21 = vadd.f32 %v968_v28, %v450_v29  ;;  %v2602_v20 = vadd.f32 %v969_v57, %v451_v40  ;;  %v1188_v40 = vld [vmem:[%s3627_s2] sm:$0xff]  ;;  %v980_v57 = vmul.f32 %v2444_v32, %v768_v49  ;;  %v981_v29 = vmul.f32 %v2446_v12, %v768_v49  ;;  %v1189_v49 = vld [vmem:[%s3627_s2 + $0x8] sm:$0xff] }
 0x14b   :  { %911 = vperm.xlu2 %2033, %v83_v0  }
 0x14c   :  { %404 = vperm.xlu0 %2035, %v86_v31   ;;  %907 = vperm.xlu1 %2032, %v2316_v59  }
 0x14e   :  { %v780_v54 = vpop.permute.xlu2 %779  ;;  %v195_v39 = vpop.permute.xlu0 %194 }
 0x14f   :  { %v456_v34 = vmul.f32 %v2440_v62, %v195_v39  ;;  %v457_v3 = vmul.f32 %v2442_v17, %v195_v39  ;;  %v2609_v55 = vpop.permute.xlu1 %739 }
 0x151   :  { %v2614_v0 = vadd.f32 %v974_v18, %v456_v34  ;;  %v2616_v28 = vadd.f32 %v975_v11, %v457_v3  ;;  %v1193_v3 = vld [vmem:[%s3627_s2 + $0x28] sm:$0xff]  ;;  %v3726_v11 = vmov 0  }
 0x153   :  { %3722 = vst [vmem:[#allocation50_spill] sm:$0xff] %v2614_v0  ;;  %923 = vperm.xlu2 %2033, %v86_v31  }
 0x154   :  { %3723 = vst [vmem:[#allocation51_spill] sm:$0xff] %v2616_v28  ;;  %1254 = vperm.xlu0 %2035, %v1188_v40   ;;  %919 = vperm.xlu1 %2032, %v2331_v1   ;;  %v1190_v1 = vld [vmem:[%s3627_s2 + $0x10] sm:$0xff] }
 0x156   :  { %v792_v59 = vpop.permute.xlu2 %791  ;;  %v210_v44 = vpop.permute.xlu0 %209 }
 0x157   :  { %v462_v39 = vmul.f32 %v2440_v62, %v210_v44  ;;  %v463_v38 = vmul.f32 %v2442_v17, %v210_v44  ;;  %v2623_v37 = vpop.permute.xlu1 %751  ;;  %v987_v44 = vmul.f32 %v2446_v12, %v780_v54 }
 0x159   :  { %v2628_v31 = vadd.f32 %v980_v57, %v462_v39  ;;  %v2630_v18 = vadd.f32 %v981_v29, %v463_v38  ;;  %v986_v38 = vmul.f32 %v2444_v32, %v780_v54  ;;  %v1191_v54 = vld [vmem:[%s3627_s2 + $0x18] sm:$0xff] }
 0x15b   :  { %3724 = vst [vmem:[#allocation52_spill] sm:$0xff] %v2628_v31  ;;  %2037 = vset.pattern.permute.xlu2 %v3726_v11 }
 0x15c   :  { %3725 = vst [vmem:[#allocation53_spill] sm:$0xff] %v2630_v18  ;;  %1279 = vperm.xlu0 %2035, %v1193_v3   ;;  %2036 = vset.pattern.permute.xlu1 %v3726_v11  ;;  %v1196_v3 = vld [vmem:[%s3627_s2 + $0x40] sm:$0xff]  ;;  %v992_v18 = vmul.f32 %v2444_v32, %v792_v59 }
 0x15d   :  { %1264 = vperm.xlu2 %2037, %v1190_v1   ;;  %1259 = vperm.xlu1 %2036, %v1189_v49   ;;  %v1192_v49 = vld [vmem:[%s3627_s2 + $0x20] sm:$0xff] }
 0x15e   :  { %v804_v34 = vpop.permute.xlu2 %803  ;;  %v225_v40 = vpop.permute.xlu0 %224 }
 0x15f   :  { %v468_v57 = vmul.f32 %v2440_v62, %v225_v40  ;;  %v469_v29 = vmul.f32 %v2442_v17, %v225_v40  ;;  %v2644_v39 = vpop.permute.xlu1 %763  ;;  %v998_v28 = vmul.f32 %v2444_v32, %v804_v34 }
 0x161   :  { %v2649_v31 = vadd.f32 %v986_v38, %v468_v57  ;;  %v2651_v1 = vadd.f32 %v987_v44, %v469_v29  ;;  %v993_v38 = vmul.f32 %v2446_v12, %v792_v59  ;;  %v1194_v59 = vld [vmem:[%s3627_s2 + $0x30] sm:$0xff] }
 0x163   :  { %3727 = vst [vmem:[#allocation54_spill] sm:$0xff] %v2649_v31 }
 0x164   :  { %3728 = vst [vmem:[#allocation55_spill] sm:$0xff] %v2651_v1  ;;  %1294 = vperm.xlu0 %2035, %v1196_v3   ;;  %v1199_v1 = vld [vmem:[%s3627_s2 + $0x58] sm:$0xff] }
 0x165   :  { %1274 = vperm.xlu2 %2037, %v1192_v49   ;;  %1269 = vperm.xlu1 %2036, %v1191_v54   ;;  %v1195_v49 = vld [vmem:[%s3627_s2 + $0x38] sm:$0xff] }
 0x166   :  { %v816_v11 = vpop.permute.xlu2 %815  ;;  %v240_v40 = vpop.permute.xlu0 %239 }
 0x167   :  { %v474_v44 = vmul.f32 %v2440_v62, %v240_v40  ;;  %v475_v57 = vmul.f32 %v2442_v17, %v240_v40  ;;  %v2663_v29 = vpop.permute.xlu1 %775 }
 0x169   :  { %v2668_v31 = vadd.f32 %v992_v18, %v474_v44  ;;  %v2670_v3 = vadd.f32 %v993_v38, %v475_v57  ;;  %v999_v18 = vmul.f32 %v2446_v12, %v804_v34  ;;  %v1197_v34 = vld [vmem:[%s3627_s2 + $0x48] sm:$0xff] }
 0x16b   :  { %3729 = vst [vmem:[#allocation56_spill] sm:$0xff] %v2668_v31 }
 0x16c   :  { %3730 = vst [vmem:[#allocation57_spill] sm:$0xff] %v2670_v3  ;;  %1309 = vperm.xlu0 %2035, %v1199_v1   ;;  %v1202_v3 = vld [vmem:[%s3627_s2 + $0x70] sm:$0xff] }
 0x16d   :  { %1289 = vperm.xlu2 %2037, %v1195_v49   ;;  %1284 = vperm.xlu1 %2036, %v1194_v59   ;;  %v1198_v49 = vld [vmem:[%s3627_s2 + $0x50] sm:$0xff] }
 0x16e   :  { %v828_v54 = vpop.permute.xlu2 %827  ;;  %v255_v40 = vpop.permute.xlu0 %254 }
 0x16f   :  { %v480_v38 = vmul.f32 %v2440_v62, %v255_v40  ;;  %v481_v44 = vmul.f32 %v2442_v17, %v255_v40  ;;  %v2682_v57 = vpop.permute.xlu1 %787 }
 0x170   :  { %3731 = vst [vmem:[#allocation58_spill] sm:$0xff] %v2682_v57  ;;  %v1004_v57 = vmul.f32 %v2444_v32, %v816_v11 }
 0x171   :  { %v2687_v31 = vadd.f32 %v998_v28, %v480_v38  ;;  %v2689_v1 = vadd.f32 %v999_v18, %v481_v44  ;;  %v1005_v28 = vmul.f32 %v2446_v12, %v816_v11  ;;  %v1200_v11 = vld [vmem:[%s3627_s2 + $0x60] sm:$0xff] }
 0x173   :  { %3732 = vst [vmem:[#allocation59_spill] sm:$0xff] %v2687_v31 }
 0x174   :  { %3733 = vst [vmem:[#allocation60_spill] sm:$0xff] %v2689_v1  ;;  %1324 = vperm.xlu0 %2035, %v1202_v3   ;;  %v1205_v1 = vld [vmem:[%s3627_s2 + $0x88] sm:$0xff] }
 0x175   :  { %1304 = vperm.xlu2 %2037, %v1198_v49   ;;  %1299 = vperm.xlu1 %2036, %v1197_v34   ;;  %v1201_v49 = vld [vmem:[%s3627_s2 + $0x68] sm:$0xff] }
 0x176   :  { %v840_v59 = vpop.permute.xlu2 %839  ;;  %v270_v40 = vpop.permute.xlu0 %269 }
 0x177   :  { %v486_v18 = vmul.f32 %v2440_v62, %v270_v40  ;;  %v487_v38 = vmul.f32 %v2442_v17, %v270_v40  ;;  %v2701_v44 = vpop.permute.xlu1 %799 }
 0x178   :  { %3734 = vst [vmem:[#allocation61_spill] sm:$0xff] %v2701_v44  ;;  %v1010_v44 = vmul.f32 %v2444_v32, %v828_v54 }
 0x179   :  { %v2706_v31 = vadd.f32 %v1004_v57, %v486_v18  ;;  %v2708_v3 = vadd.f32 %v1005_v28, %v487_v38  ;;  %v1011_v57 = vmul.f32 %v2446_v12, %v828_v54  ;;  %v1203_v54 = vld [vmem:[%s3627_s2 + $0x78] sm:$0xff] }
 0x17b   :  { %3735 = vst [vmem:[#allocation62_spill] sm:$0xff] %v2706_v31 }
 0x17c   :  { %3736 = vst [vmem:[#allocation63_spill] sm:$0xff] %v2708_v3  ;;  %1339 = vperm.xlu0 %2035, %v1205_v1   ;;  %v1208_v3 = vld [vmem:[%s3627_s2 + $0xa0] sm:$0xff] }
 0x17d   :  { %1319 = vperm.xlu2 %2037, %v1201_v49   ;;  %1314 = vperm.xlu1 %2036, %v1200_v11   ;;  %v1204_v49 = vld [vmem:[%s3627_s2 + $0x80] sm:$0xff] }
 0x17e   :  { %v852_v34 = vpop.permute.xlu2 %851  ;;  %v285_v40 = vpop.permute.xlu0 %284 }
 0x17f   :  { %v492_v28 = vmul.f32 %v2440_v62, %v285_v40  ;;  %v493_v18 = vmul.f32 %v2442_v17, %v285_v40  ;;  %v2720_v38 = vpop.permute.xlu1 %811 }
 0x180   :  { %3737 = vst [vmem:[#allocation64_spill] sm:$0xff] %v2720_v38  ;;  %v1016_v38 = vmul.f32 %v2444_v32, %v840_v59 }
 0x181   :  { %v2725_v31 = vadd.f32 %v1010_v44, %v492_v28  ;;  %v2727_v1 = vadd.f32 %v1011_v57, %v493_v18  ;;  %v1017_v44 = vmul.f32 %v2446_v12, %v840_v59  ;;  %v1206_v59 = vld [vmem:[%s3627_s2 + $0x90] sm:$0xff] }
 0x183   :  { %3738 = vst [vmem:[#allocation65_spill] sm:$0xff] %v2725_v31 }
 0x184   :  { %3739 = vst [vmem:[#allocation66_spill] sm:$0xff] %v2727_v1  ;;  %1354 = vperm.xlu0 %2035, %v1208_v3   ;;  %v1211_v1 = vld [vmem:[%s3627_s2 + $0xb8] sm:$0xff] }
 0x185   :  { %1334 = vperm.xlu2 %2037, %v1204_v49   ;;  %1329 = vperm.xlu1 %2036, %v1203_v54   ;;  %v1207_v49 = vld [vmem:[%s3627_s2 + $0x98] sm:$0xff] }
 0x186   :  { %v864_v11 = vpop.permute.xlu2 %863  ;;  %v300_v40 = vpop.permute.xlu0 %299 }
 0x187   :  { %v498_v57 = vmul.f32 %v2440_v62, %v300_v40  ;;  %v499_v28 = vmul.f32 %v2442_v17, %v300_v40  ;;  %v2739_v18 = vpop.permute.xlu1 %823 }
 0x188   :  { %3740 = vst [vmem:[#allocation67_spill] sm:$0xff] %v2739_v18  ;;  %v1022_v18 = vmul.f32 %v2444_v32, %v852_v34 }
 0x189   :  { %v2744_v31 = vadd.f32 %v1016_v38, %v498_v57  ;;  %v2746_v3 = vadd.f32 %v1017_v44, %v499_v28  ;;  %v1023_v38 = vmul.f32 %v2446_v12, %v852_v34  ;;  %v1209_v34 = vld [vmem:[%s3627_s2 + $0xa8] sm:$0xff] }
 0x18b   :  { %3741 = vst [vmem:[#allocation68_spill] sm:$0xff] %v2744_v31 }
 0x18c   :  { %3742 = vst [vmem:[#allocation69_spill] sm:$0xff] %v2746_v3  ;;  %1369 = vperm.xlu0 %2035, %v1211_v1   ;;  %v1214_v3 = vld [vmem:[%s3627_s2 + $0xd0] sm:$0xff] }
 0x18d   :  { %1349 = vperm.xlu2 %2037, %v1207_v49   ;;  %1344 = vperm.xlu1 %2036, %v1206_v59   ;;  %v1210_v49 = vld [vmem:[%s3627_s2 + $0xb0] sm:$0xff] }
 0x18e   :  { %v876_v54 = vpop.permute.xlu2 %875  ;;  %v315_v40 = vpop.permute.xlu0 %314 }
 0x18f   :  { %v504_v44 = vmul.f32 %v2440_v62, %v315_v40  ;;  %v505_v57 = vmul.f32 %v2442_v17, %v315_v40  ;;  %v2758_v28 = vpop.permute.xlu1 %835 }
 0x190   :  { %3743 = vst [vmem:[#allocation70_spill] sm:$0xff] %v2758_v28  ;;  %v1028_v28 = vmul.f32 %v2444_v32, %v864_v11 }
 0x191   :  { %v2763_v31 = vadd.f32 %v1022_v18, %v504_v44  ;;  %v2765_v1 = vadd.f32 %v1023_v38, %v505_v57  ;;  %v1029_v18 = vmul.f32 %v2446_v12, %v864_v11  ;;  %v1212_v11 = vld [vmem:[%s3627_s2 + $0xc0] sm:$0xff] }
 0x193   :  { %3744 = vst [vmem:[#allocation71_spill] sm:$0xff] %v2763_v31  ;;  %v1251_v31 = vld [vmem:[%s3627_s2 + $0x1f8] sm:$0xff] }
 0x194   :  { %3745 = vst [vmem:[#allocation72_spill] sm:$0xff] %v2765_v1  ;;  %1384 = vperm.xlu0 %2035, %v1214_v3  }
 0x195   :  { %1364 = vperm.xlu2 %2037, %v1210_v49   ;;  %1359 = vperm.xlu1 %2036, %v1209_v34   ;;  %v1213_v49 = vld [vmem:[%s3627_s2 + $0xc8] sm:$0xff] }
 0x196   :  { %v888_v59 = vpop.permute.xlu2 %887  ;;  %v330_v40 = vpop.permute.xlu0 %329 }
 0x197   :  { %v510_v38 = vmul.f32 %v2440_v62, %v330_v40  ;;  %v511_v44 = vmul.f32 %v2442_v17, %v330_v40  ;;  %v2777_v57 = vpop.permute.xlu1 %847 }
 0x198   :  { %3746 = vst [vmem:[#allocation73_spill] sm:$0xff] %v2777_v57  ;;  %v1034_v57 = vmul.f32 %v2444_v32, %v876_v54 }
 0x199   :  { %v2782_v0 = vadd.f32 %v1028_v28, %v510_v38  ;;  %v2784_v3 = vadd.f32 %v1029_v18, %v511_v44  ;;  %v1035_v28 = vmul.f32 %v2446_v12, %v876_v54 }
 0x19b   :  { %3747 = vst [vmem:[#allocation74_spill] sm:$0xff] %v2782_v0  ;;  %v509_v0 = vmul.f32 %v2442_v17, %v2400_v14 }
 0x19c   :  { %3748 = vst [vmem:[#allocation75_spill] sm:$0xff] %v2784_v3  ;;  %1569 = vperm.xlu0 %2035, %v1251_v31   ;;  %v508_v3 = vmul.f32 %v2440_v62, %v2400_v14  ;;  %v1235_v14 = vld [vmem:[%s3627_s2 + $0x178] sm:$0xff] }
 0x19d   :  { %1379 = vperm.xlu2 %2037, %v1213_v49   ;;  %1374 = vperm.xlu1 %2036, %v1212_v11   ;;  %v1250_v11 = vld [vmem:[%s3627_s2 + $0x1f0] sm:$0xff] }
 0x19e   :  { %v900_v34 = vpop.permute.xlu2 %899  ;;  %v345_v40 = vpop.permute.xlu0 %344 }
 0x19f   :  { %v516_v18 = vmul.f32 %v2440_v62, %v345_v40  ;;  %v517_v38 = vmul.f32 %v2442_v17, %v345_v40  ;;  %v860_v44 = vpop.permute.xlu1 %859  ;;  %v1234_v40 = vld [vmem:[%s3627_s2 + $0x170] sm:$0xff] }
 0x1a0   :  { %v1026_v31 = vmul.f32 %v2444_v32, %v860_v44  ;;  %v1027_v49 = vmul.f32 %v2446_v12, %v860_v44 }
 0x1a1   :  { %v2805_v54 = vadd.f32 %v1034_v57, %v516_v18  ;;  %v2807_v1 = vadd.f32 %v1035_v28, %v517_v38  ;;  %v1040_v28 = vmul.f32 %v2444_v32, %v888_v59  ;;  %v1041_v18 = vmul.f32 %v2446_v12, %v888_v59 }
 0x1a2   :  { %v2815_v26 = vadd.f32 %v1027_v49, %v509_v0  ;;  %v2817_v61 = vadd.f32 %v1026_v31, %v508_v3  ;;  %v514_v0 = vmul.f32 %v2440_v62, %v2410_v6  ;;  %v515_v3 = vmul.f32 %v2442_v17, %v2410_v6  ;;  %v1219_v6 = vld [vmem:[%s3627_s2 + $0xf8] sm:$0xff] }
 0x1a3   :  { %3749 = vst [vmem:[#allocation76_spill] sm:$0xff] %v2805_v54 }
 0x1a4   :  { %3750 = vst [vmem:[#allocation77_spill] sm:$0xff] %v2807_v1  ;;  %1564 = vperm.xlu0 %2035, %v1250_v11   ;;  %v1249_v11 = vld [vmem:[%s3627_s2 + $0x1e8] sm:$0xff] }
 0x1a5   :  { %3751 = vst [vmem:[#allocation78_spill] sm:$0xff] %v2815_v26  ;;  %1484 = vperm.xlu2 %2037, %v1234_v40   ;;  %1489 = vperm.xlu1 %2036, %v1235_v14   ;;  %v1233_v14 = vld [vmem:[%s3627_s2 + $0x168] sm:$0xff] }
 0x1a6   :  { %3752 = vst [vmem:[#allocation79_spill] sm:$0xff] %v2817_v61  ;;  %v912_v44 = vpop.permute.xlu2 %911  ;;  %v360_v57 = vpop.permute.xlu0 %359 }
 0x1a7   :  { %v522_v38 = vmul.f32 %v2440_v62, %v360_v57  ;;  %v523_v1 = vmul.f32 %v2442_v17, %v360_v57  ;;  %v872_v54 = vpop.permute.xlu1 %871 }
 0x1a8   :  { %v1032_v31 = vmul.f32 %v2444_v32, %v872_v54  ;;  %v1033_v49 = vmul.f32 %v2446_v12, %v872_v54 }
 0x1a9   :  { %v2832_v59 = vadd.f32 %v1040_v28, %v522_v38  ;;  %v2834_v40 = vadd.f32 %v1041_v18, %v523_v1  ;;  %v1046_v1 = vmul.f32 %v2444_v32, %v900_v34  ;;  %v1047_v18 = vmul.f32 %v2446_v12, %v900_v34 }
 0x1aa   :  { %v2842_v57 = vadd.f32 %v1032_v31, %v514_v0  ;;  %v2844_v61 = vadd.f32 %v1033_v49, %v515_v3  ;;  %v520_v0 = vmul.f32 %v2440_v62, %v2420_v16  ;;  %v521_v3 = vmul.f32 %v2442_v17, %v2420_v16  ;;  %v1218_v16 = vld [vmem:[%s3627_s2 + $0xf0] sm:$0xff] }
 0x1ab   :  { %3753 = vst [vmem:[#allocation80_spill] sm:$0xff] %v2832_v59 }
 0x1ac   :  { %3754 = vst [vmem:[#allocation81_spill] sm:$0xff] %v2834_v40  ;;  %1559 = vperm.xlu0 %2035, %v1249_v11   ;;  %v1248_v11 = vld [vmem:[%s3627_s2 + $0x1e0] sm:$0xff] }
 0x1ad   :  { %3755 = vst [vmem:[#allocation82_spill] sm:$0xff] %v2842_v57  ;;  %1479 = vperm.xlu2 %2037, %v1233_v14   ;;  %1409 = vperm.xlu1 %2036, %v1219_v6   ;;  %v1232_v6 = vld [vmem:[%s3627_s2 + $0x160] sm:$0xff] }
 0x1ae   :  { %3756 = vst [vmem:[#allocation83_spill] sm:$0xff] %v2844_v61  ;;  %v924_v54 = vpop.permute.xlu2 %923  ;;  %v375_v28 = vpop.permute.xlu0 %374 }
 0x1af   :  { %v528_v38 = vmul.f32 %v2440_v62, %v375_v28  ;;  %v529_v40 = vmul.f32 %v2442_v17, %v375_v28  ;;  %v884_v59 = vpop.permute.xlu1 %883 }
 0x1b0   :  { %v1038_v31 = vmul.f32 %v2444_v32, %v884_v59  ;;  %v1039_v49 = vmul.f32 %v2446_v12, %v884_v59 }
 0x1b1   :  { %v2859_v34 = vadd.f32 %v1046_v1, %v528_v38  ;;  %v2861_v14 = vadd.f32 %v1047_v18, %v529_v40  ;;  %v1052_v1 = vmul.f32 %v2444_v32, %v912_v44  ;;  %v1053_v40 = vmul.f32 %v2446_v12, %v912_v44  ;;  %v1247_v44 = vld [vmem:[%s3627_s2 + $0x1d8] sm:$0xff] }
 0x1b2   :  { %v2869_v28 = vadd.f32 %v1038_v31, %v520_v0  ;;  %v2871_v61 = vadd.f32 %v1039_v49, %v521_v3  ;;  %v526_v0 = vmul.f32 %v2440_v62, %v2430_v5  ;;  %v527_v3 = vmul.f32 %v2442_v17, %v2430_v5  ;;  %v1231_v5 = vld [vmem:[%s3627_s2 + $0x158] sm:$0xff] }
 0x1b3   :  { %3757 = vst [vmem:[#allocation84_spill] sm:$0xff] %v2859_v34 }
 0x1b4   :  { %3758 = vst [vmem:[#allocation85_spill] sm:$0xff] %v2861_v14  ;;  %1554 = vperm.xlu0 %2035, %v1248_v11  }
 0x1b5   :  { %3759 = vst [vmem:[#allocation86_spill] sm:$0xff] %v2869_v28  ;;  %1474 = vperm.xlu2 %2037, %v1232_v6   ;;  %1404 = vperm.xlu1 %2036, %v1218_v16   ;;  %v940_v16 = vmul.f32 %v2444_v32, %v2493_v13 }
 0x1b6   :  { %3760 = vst [vmem:[#allocation87_spill] sm:$0xff] %v2871_v61  ;;  %v390_v59 = vpop.permute.xlu0 %389 }
 0x1b7   :  { %v534_v18 = vmul.f32 %v2440_v62, %v390_v59  ;;  %v535_v38 = vmul.f32 %v2442_v17, %v390_v59  ;;  %v896_v57 = vpop.permute.xlu1 %895  ;;  %v2877_v34 = vpop.permute.xlu2 %1264  ;;  %v941_v59 = vmul.f32 %v2446_v12, %v2493_v13  ;;  %v532_v13 = vmul.f32 %v2440_v62, %v2449_v22 }
 0x1b8   :  { %v1044_v31 = vmul.f32 %v2444_v32, %v896_v57  ;;  %v1045_v49 = vmul.f32 %v2446_v12, %v896_v57  ;;  %v1217_v57 = vld [vmem:[%s3627_s2 + $0xe8] sm:$0xff] }
 0x1b9   :  { %v2888_v11 = vadd.f32 %v1052_v1, %v534_v18  ;;  %v2890_v6 = vadd.f32 %v1053_v40, %v535_v38  ;;  %v422_v40 = vmul.f32 %v2440_v62, %v2214_v27  ;;  %v423_v18 = vmul.f32 %v2442_v17, %v2214_v27 }
 0x1ba   :  { %v2902_v61 = vadd.f32 %v1044_v31, %v526_v0  ;;  %v2904_v1 = vadd.f32 %v1045_v49, %v527_v3  ;;  %v533_v38 = vmul.f32 %v2442_v17, %v2449_v22  ;;  %v1058_v3 = vmul.f32 %v2444_v32, %v924_v54 }
 0x1bb   :  { %3761 = vst [vmem:[#allocation88_spill] sm:$0xff] %v2888_v11  ;;  %v1068_v0 = vadd.f32 %v940_v16, %v422_v40  ;;  %v1069_v31 = vadd.f32 %v941_v59, %v423_v18  ;;  %v1059_v49 = vmul.f32 %v2446_v12, %v924_v54  ;;  %v1246_v16 = vld [vmem:[%s3627_s2 + $0x1d0] sm:$0xff]  ;;  %v1216_v40 = vld [vmem:[%s3627_s2 + $0xe0] sm:$0xff] }
 0x1bc   :  { %3762 = vst [vmem:[#allocation89_spill] sm:$0xff] %v2890_v6  ;;  %1549 = vperm.xlu0 %2035, %v1247_v44  }
 0x1bd   :  { %3763 = vst [vmem:[#allocation90_spill] sm:$0xff] %v2902_v61  ;;  %1469 = vperm.xlu2 %2037, %v1231_v5   ;;  %1399 = vperm.xlu1 %2036, %v1217_v57  }
 0x1be   :  { %3764 = vst [vmem:[#allocation91_spill] sm:$0xff] %v2904_v1  ;;  %v405_v28 = vpop.permute.xlu0 %404 }
 0x1bf   :  { %v540_v1 = vmul.f32 %v2440_v62, %v405_v28  ;;  %v541_v27 = vmul.f32 %v2442_v17, %v405_v28  ;;  %v908_v44 = vpop.permute.xlu1 %907  ;;  %v1275_v5 = vpop.permute.xlu2 %1274  ;;  %v1230_v28 = vld [vmem:[%s3627_s2 + $0x150] sm:$0xff] }
 0x1c0   :  { %v1050_v57 = vmul.f32 %v2444_v32, %v908_v44  ;;  %v1051_v61 = vmul.f32 %v2446_v12, %v908_v44  ;;  %v2920_v14 = vadd.f32 %v1275_v5, %v1068_v0  ;;  %v2922_v22 = vadd.f32 %v1275_v5, %v1069_v31  ;;  %v1229_v5 = vld [vmem:[%s3627_s2 + $0x148] sm:$0xff] }
 0x1c1   :  { %v2927_v59 = vadd.f32 %v1059_v49, %v541_v27  ;;  %v2929_v54 = vadd.f32 %v1058_v3, %v540_v1  ;;  %v538_v44 = vmul.f32 %v2440_v62, %v2463_v63 }
 0x1c2   :  { %3765 = vst [vmem:[#allocation92_spill] sm:$0xff] %v2922_v22  ;;  %v2937_v18 = vadd.f32 %v1050_v57, %v532_v13  ;;  %v2939_v0 = vadd.f32 %v1051_v61, %v533_v38  ;;  %v539_v61 = vmul.f32 %v2442_v17, %v2463_v63  ;;  %v1215_v57 = vld [vmem:[%s3627_s2 + $0xd8] sm:$0xff] }
 0x1c4   :  { %3766 = vst [vmem:[#allocation93_spill] sm:$0xff] %v2937_v18  ;;  %1544 = vperm.xlu0 %2035, %v1246_v16  }
 0x1c5   :  { %3767 = vst [vmem:[#allocation94_spill] sm:$0xff] %v2939_v0  ;;  %1464 = vperm.xlu2 %2037, %v1230_v28   ;;  %1394 = vperm.xlu1 %2036, %v1216_v40   ;;  %v425_v28 = vmul.f32 %v2442_v17, %v2225_v30 }
 0x1c6   :  { %v1255_v31 = vpop.permute.xlu0 %1254 }
 0x1c7   :  { %v2942_v49 = vadd.f32 %v1255_v31, %v2530_v60  ;;  %v2945_v1 = vadd.f32 %v1255_v31, %v2532_v8  ;;  %v920_v3 = vpop.permute.xlu1 %919  ;;  %v2947_v27 = vpop.permute.xlu2 %1289  ;;  %v943_v60 = vmul.f32 %v2446_v12, %v2553_v25  ;;  %v1227_v8 = vld [vmem:[%s3627_s2 + $0x138] sm:$0xff] }
 0x1c8   :  { %v1056_v13 = vmul.f32 %v2444_v32, %v920_v3  ;;  %v1057_v38 = vmul.f32 %v2446_v12, %v920_v3 }
 0x1c9   :  { %3768 = vst [vmem:[#allocation95_spill] sm:$0xff] %v2942_v49  ;;  %v1071_v40 = vadd.f32 %v943_v60, %v425_v28  ;;  %v939_v60 = vmul.f32 %v2446_v12, %v2539_v23 }
 0x1ca   :  { %3769 = vst [vmem:[#allocation96_spill] sm:$0xff] %v2945_v1  ;;  %v2966_v63 = vadd.f32 %v1056_v13, %v538_v44  ;;  %v2968_v16 = vadd.f32 %v1057_v38, %v539_v61  ;;  %v949_v13 = vmul.f32 %v2446_v12, %v2567_v4  ;;  %v1243_v38 = vld [vmem:[%s3627_s2 + $0x1b8] sm:$0xff] }
 0x1cc   :  { %3770 = vst [vmem:[#allocation97_spill] sm:$0xff] %v2966_v63  ;;  %1449 = vperm.xlu0 %2035, %v1227_v8   ;;  %v1245_v8 = vld [vmem:[%s3627_s2 + $0x1c8] sm:$0xff] }
 0x1cd   :  { %3771 = vst [vmem:[#allocation98_spill] sm:$0xff] %v2968_v16  ;;  %1459 = vperm.xlu2 %2037, %v1229_v5   ;;  %1389 = vperm.xlu1 %2036, %v1215_v57   ;;  %v972_v16 = vmul.f32 %v2444_v32, %v2623_v37 }
 0x1ce   :  { %v2972_v31 = vpop.permute.xlu0 %1279 }
 0x1cf   :  { %v2975_v3 = vadd.f32 %v2972_v31, %v1071_v40  ;;  %v2977_v1 = vpop.permute.xlu2 %1304  ;;  %v1260_v22 = vpop.permute.xlu1 %1259 }
 0x1d0   :  { %v2980_v44 = vadd.f32 %v1260_v22, %v2526_v15  ;;  %v2983_v61 = vadd.f32 %v1260_v22, %v2528_v35  ;;  %v1228_v15 = vld [vmem:[%s3627_s2 + $0x140] sm:$0xff]  ;;  %v431_v35 = vmul.f32 %v2442_v17, %v2236_v33  ;;  %v421_v22 = vmul.f32 %v2442_v17, %v2266_v43 }
 0x1d1   :  { %3772 = vst [vmem:[#allocation99_spill] sm:$0xff] %v2975_v3  ;;  %v955_v3 = vmul.f32 %v2446_v12, %v2581_v50 }
 0x1d2   :  { %3773 = vst [vmem:[#allocation100_spill] sm:$0xff] %v2980_v44  ;;  %v1077_v5 = vadd.f32 %v949_v13, %v431_v35  ;;  %v1067_v28 = vadd.f32 %v939_v60, %v421_v22  ;;  %v1224_v13 = vld [vmem:[%s3627_s2 + $0x120] sm:$0xff] }
 0x1d3   :  { %3774 = vst [vmem:[#allocation101_spill] sm:$0xff] %v2983_v61  ;;  %v1244_v60 = vld [vmem:[%s3627_s2 + $0x1c0] sm:$0xff] }
 0x1d4   :  { %1529 = vperm.xlu0 %2035, %v1243_v38   ;;  %v1226_v38 = vld [vmem:[%s3627_s2 + $0x130] sm:$0xff] }
 0x1d5   :  { %1539 = vperm.xlu2 %2037, %v1245_v8   ;;  %1454 = vperm.xlu1 %2036, %v1228_v15   ;;  %v437_v8 = vmul.f32 %v2442_v17, %v2247_v36 }
 0x1d6   :  { %v3002_v57 = vpop.permute.xlu0 %1294 }
 0x1d7   :  { %v3005_v40 = vadd.f32 %v3002_v57, %v1077_v5  ;;  %v3007_v61 = vpop.permute.xlu2 %1319  ;;  %v3009_v0 = vpop.permute.xlu1 %1269  ;;  %v1083_v15 = vadd.f32 %v955_v3, %v437_v8  ;;  %v1242_v3 = vld [vmem:[%s3627_s2 + $0x1b0] sm:$0xff] }
 0x1d8   :  { %v3012_v18 = vadd.f32 %v3009_v0, %v1067_v28 }
 0x1d9   :  { %3775 = vst [vmem:[#allocation102_spill] sm:$0xff] %v3005_v40 }
 0x1da   :  { %3776 = vst [vmem:[#allocation103_spill] sm:$0xff] %v3012_v18 }
 0x1dc   :  { %1434 = vperm.xlu0 %2035, %v1224_v13   ;;  %v1240_v13 = vld [vmem:[%s3627_s2 + $0x1a0] sm:$0xff] }
 0x1dd   :  { %1444 = vperm.xlu2 %2037, %v1226_v38   ;;  %1534 = vperm.xlu1 %2036, %v1244_v60   ;;  %v1225_v38 = vld [vmem:[%s3627_s2 + $0x128] sm:$0xff] }
 0x1de   :  { %v3027_v35 = vpop.permute.xlu0 %1309 }
 0x1df   :  { %v3030_v22 = vadd.f32 %v3027_v35, %v1083_v15  ;;  %v3032_v5 = vpop.permute.xlu2 %1334  ;;  %v3034_v28 = vpop.permute.xlu1 %1284  ;;  %v966_v15 = vmul.f32 %v2444_v32, %v2609_v55 }
 0x1e0   :  { %3778 = vst [vmem:[#allocation105_spill] sm:$0xff] %v3032_v5  ;;  %v3038_v18 = vadd.f32 %v3034_v28, %v2546_v19  ;;  %v967_v5 = vmul.f32 %v2446_v12, %v2609_v55 }
 0x1e1   :  { %3777 = vst [vmem:[#allocation104_spill] sm:$0xff] %v3030_v22 }
 0x1e2   :  { %3779 = vst [vmem:[#allocation106_spill] sm:$0xff] %v3038_v18  ;;  %v1221_v18 = vld [vmem:[%s3627_s2 + $0x108] sm:$0xff] }
 0x1e4   :  { %1514 = vperm.xlu0 %2035, %v1240_v13   ;;  %v1223_v13 = vld [vmem:[%s3627_s2 + $0x118] sm:$0xff] }
 0x1e5   :  { %1524 = vperm.xlu2 %2037, %v1242_v3   ;;  %1439 = vperm.xlu1 %2036, %v1225_v38   ;;  %v1241_v3 = vld [vmem:[%s3627_s2 + $0x1a8] sm:$0xff]  ;;  %v448_v38 = vmul.f32 %v2440_v62, %v2277_v46 }
 0x1e6   :  { %v3049_v60 = vpop.permute.xlu0 %1324 }
 0x1e7   :  { %v3051_v8 = vpop.permute.xlu2 %1349  ;;  %v3053_v19 = vpop.permute.xlu1 %1299  ;;  %v1094_v55 = vadd.f32 %v966_v15, %v448_v38  ;;  %v442_v15 = vmul.f32 %v2440_v62, %v2262_v41 }
 0x1e8   :  { %3780 = vst [vmem:[#allocation107_spill] sm:$0xff] %v3051_v8  ;;  %v449_v8 = vmul.f32 %v2442_v17, %v2277_v46  ;;  %v973_v46 = vmul.f32 %v2446_v12, %v2623_v37  ;;  %v455_v37 = vmul.f32 %v2442_v17, %v2292_v51 }
 0x1ea   :  { %v1095_v40 = vadd.f32 %v967_v5, %v449_v8  ;;  %v960_v5 = vmul.f32 %v2444_v32, %v2595_v45  ;;  %v454_v8 = vmul.f32 %v2440_v62, %v2292_v51  ;;  %v1101_v38 = vadd.f32 %v973_v46, %v455_v37 }
 0x1ec   :  { %1419 = vperm.xlu0 %2035, %v1221_v18   ;;  %v1237_v18 = vld [vmem:[%s3627_s2 + $0x188] sm:$0xff] }
 0x1ed   :  { %1429 = vperm.xlu2 %2037, %v1223_v13   ;;  %1519 = vperm.xlu1 %2036, %v1241_v3   ;;  %v440_v13 = vmul.f32 %v2440_v62, %v2311_v58  ;;  %v1100_v3 = vadd.f32 %v972_v16, %v454_v8  ;;  %v954_v16 = vmul.f32 %v2444_v32, %v2581_v50 }
 0x1ee   :  { %v1340_v6 = vpop.permute.xlu0 %1339  ;;  %v436_v8 = vmul.f32 %v2440_v62, %v2247_v36  ;;  %v507_v50 = vmul.f32 %v2442_v17, %v2435_v24  ;;  %v460_v36 = vmul.f32 %v2440_v62, %v2307_v56 }
 0x1ef   :  { %v3072_v11 = vadd.f32 %v1340_v6, %v1094_v55  ;;  %v3074_v22 = vadd.f32 %v1340_v6, %v1095_v40  ;;  %v3076_v49 = vpop.permute.xlu2 %1364  ;;  %v3078_v26 = vpop.permute.xlu1 %1314  ;;  %v1239_v6 = vld [vmem:[%s3627_s2 + $0x198] sm:$0xff]  ;;  %v1222_v40 = vld [vmem:[%s3627_s2 + $0x110] sm:$0xff]  ;;  %v958_v55 = vmul.f32 %v2444_v32, %v2294_v52 }
 0x1f0   :  { %3783 = vst [vmem:[#allocation110_spill] sm:$0xff] %v3076_v49  ;;  %v434_v49 = vmul.f32 %v2440_v62, %v2296_v53 }
 0x1f1   :  { %3781 = vst [vmem:[#allocation108_spill] sm:$0xff] %v3072_v11  ;;  %v1086_v46 = vadd.f32 %v958_v55, %v440_v13  ;;  %v461_v13 = vmul.f32 %v2442_v17, %v2307_v56  ;;  %v1082_v55 = vadd.f32 %v954_v16, %v436_v8  ;;  %v946_v56 = vmul.f32 %v2444_v32, %v2264_v42 }
 0x1f2   :  { %3782 = vst [vmem:[#allocation109_spill] sm:$0xff] %v3074_v22  ;;  %v1088_v22 = vadd.f32 %v960_v5, %v442_v15  ;;  %v1238_v15 = vld [vmem:[%s3627_s2 + $0x190] sm:$0xff] }
 0x1f4   :  { %1499 = vperm.xlu0 %2035, %v1237_v18   ;;  %v1600_v18 = vadd.f32 %v3049_v60, %v1088_v22  ;;  %v1598_v22 = vadd.f32 %v3007_v61, %v1086_v46  ;;  %v1596_v46 = vadd.f32 %v3078_v26, %v2572_v2  ;;  %v428_v2 = vmul.f32 %v2440_v62, %v2281_v48 }
 0x1f5   :  { %1509 = vperm.xlu2 %2037, %v1239_v6   ;;  %1424 = vperm.xlu1 %2036, %v1222_v40   ;;  %v952_v6 = vmul.f32 %v2444_v32, %v2279_v47  ;;  %v979_v40 = vmul.f32 %v2446_v12, %v2644_v39 }
 0x1f6   :  { %v1355_v11 = vpop.permute.xlu0 %1354  ;;  %v1726_v8 = vmax.f32 %v1598_v22, 0.0  ;;  %v1724_v22 = vmax.f32 %v1596_v46, 0.0  ;;  %v1074_v46 = vadd.f32 %v946_v56, %v428_v2 }
 0x1f7   :  { %v3107_v51 = vadd.f32 %v1355_v11, %v1100_v3  ;;  %v3109_v63 = vadd.f32 %v1355_v11, %v1101_v38  ;;  %v3111_v44 = vpop.permute.xlu2 %1379  ;;  %v3113_v41 = vpop.permute.xlu1 %1329  ;;  %v978_v11 = vmul.f32 %v2444_v32, %v2644_v39  ;;  %v430_v39 = vmul.f32 %v2440_v62, %v2236_v33 }
 0x1f8   :  { %v1602_v5 = vadd.f32 %v3113_v41, %v2588_v9  ;;  %v1220_v9 = vld [vmem:[%s3627_s2 + $0x100] sm:$0xff]  ;;  %v1080_v3 = vadd.f32 %v952_v6, %v434_v49  ;;  %v1025_v38 = vmul.f32 %v2446_v12, %v2422_v7  ;;  %v1594_v49 = vadd.f32 %v3027_v35, %v1082_v55 }
 0x1f9   :  { %3784 = vst [vmem:[#allocation111_spill] sm:$0xff] %v3107_v51  ;;  %v1106_v33 = vadd.f32 %v978_v11, %v460_v36  ;;  %v1107_v51 = vadd.f32 %v979_v40, %v461_v13 }
 0x1fa   :  { %3785 = vst [vmem:[#allocation112_spill] sm:$0xff] %v3109_v63  ;;  %v1730_v37 = vmax.f32 %v1602_v5, 0.0  ;;  %v1728_v5 = vmax.f32 %v1600_v18, 0.0  ;;  %v948_v63 = vmul.f32 %v2444_v32, %v2567_v4  ;;  %v1153_v16 = vadd.f32 %v1025_v38, %v507_v50 }
 0x1fb   :  { %v1592_v18 = vadd.f32 %v2977_v1, %v1080_v3  ;;  %v1722_v13 = vmax.f32 %v1594_v49, 0.0  ;;  %v1236_v3 = vld [vmem:[%s3627_s2 + $0x180] sm:$0xff] }
 0x1fc   :  { %1840 = vmatpush.msra.mxu0 %v1730_v37  ;;  %v1076_v36 = vadd.f32 %v948_v63, %v430_v39 }
 0x1fd   :  { %1414 = vperm.xlu2 %2037, %v1220_v9   ;;  %1504 = vperm.xlu1 %2036, %v1238_v15   ;;  %v985_v15 = vmul.f32 %v2446_v12, %v2663_v29  ;;  %v1720_v63 = vmax.f32 %v1592_v18, 0.0  ;;  %v3789_v18 = vld [vmem:[#allocation72_spill] sm:$0xff] }
 0x1fe   :  { %v1370_v6 = vpop.permute.xlu0 %1369  ;;  %1841 = vmatpush.msra.mxu0 %v1728_v5  ;;  %v1588_v55 = vadd.f32 %v3002_v57, %v1076_v36  ;;  %v1586_v5 = vadd.f32 %v2947_v27, %v1074_v46  ;;  %v3792_v36 = vld [vmem:[#allocation51_spill] sm:$0xff] }
 0x1ff   :  { %v3155_v37 = vadd.f32 %v1370_v6, %v1106_v33  ;;  %v3157_v4 = vadd.f32 %v1370_v6, %v1107_v51  ;;  %v3159_v11 = vpop.permute.xlu2 %1484  ;;  %v1345_v40 = vpop.permute.xlu1 %1344  ;;  %v1590_v51 = vadd.f32 %v3053_v19, %v2558_v10  ;;  %v424_v10 = vmul.f32 %v2440_v62, %v2225_v30  ;;  %v3788_v30 = vld [vmem:[#allocation46_spill] sm:$0xff] }
 0x200   :  { %v3162_v9 = vadd.f32 %v3159_v11, %v1153_v16  ;;  %v3165_v35 = vadd.f32 %v1345_v40, %v2600_v21  ;;  %v3168_v50 = vadd.f32 %v1345_v40, %v2602_v20  ;;  %1842 = vmatpush.msra.mxu0 %v1726_v8  ;;  %v3787_v21 = vld [vmem:[#allocation10_spill] sm:$0xff]  ;;  %v942_v20 = vmul.f32 %v2444_v32, %v2553_v25 }
 0x201   :  { %v467_v38 = vmul.f32 %v2442_v17, %v3787_v21  ;;  %v1718_v49 = vmax.f32 %v1590_v51, 0.0  ;;  %v938_v6 = vmul.f32 %v2444_v32, %v2539_v23  ;;  %v1716_v8 = vmax.f32 %v1588_v55, 0.0  ;;  %v3793_v51 = vld [vmem:[#allocation6_spill] sm:$0xff] }
 0x202   :  { %3786 = vst [vmem:[#allocation113_spill] sm:$0xff] %v3168_v50  ;;  %1843 = vmatpush.msra.mxu0 %v1724_v22  ;;  %v1070_v25 = vadd.f32 %v942_v20, %v424_v10  ;;  %v1584_v2 = vadd.f32 %v3034_v28, %v3788_v30  ;;  %v3791_v22 = vld [vmem:[#allocation50_spill] sm:$0xff]  ;;  %v420_v28 = vmul.f32 %v2440_v62, %v2266_v43  ;;  %v3795_v20 = vld [vmem:[#allocation73_spill] sm:$0xff]  ;;  %v3796_v10 = vld [vmem:[#allocation28_spill] sm:$0xff] }
 0x203   :  { %v1113_v39 = vadd.f32 %v985_v15, %v467_v38  ;;  %v1021_v55 = vmul.f32 %v2446_v12, %v3795_v20 }
 0x204   :  { %1844 = vmatpush.msra.mxu0 %v1722_v13  ;;  %v936_v13 = vmul.f32 %v2444_v32, %v3793_v51  ;;  %v1582_v46 = vadd.f32 %v2972_v31, %v1070_v25 }
 0x205   :  { %1494 = vperm.xlu1 %2036, %v1236_v3   ;;  %v3794_v3 = vld [vmem:[#allocation7_spill] sm:$0xff] }
 0x206   :  { %v3185_v33 = vpop.permute.xlu0 %1384  ;;  %1845 = vmatpush.msra.mxu0 %v1720_v63  ;;  %v418_v38 = vmul.f32 %v2440_v62, %v3794_v3  ;;  %v1714_v63 = vmax.f32 %v1586_v5, 0.0  ;;  %v1710_v43 = vmax.f32 %v1582_v46, 0.0 }
 0x207   :  { %v3190_v57 = vadd.f32 %v3185_v33, %v1113_v39  ;;  %v3192_v56 = vpop.permute.xlu2 %1479  ;;  %v1360_v16 = vpop.permute.xlu1 %1359  ;;  %v503_v39 = vmul.f32 %v2442_v17, %v3796_v10 }
 0x208   :  { %v3198_v40 = vadd.f32 %v3192_v56, %v3789_v18  ;;  %v3201_v15 = vadd.f32 %v1360_v16, %v3791_v22  ;;  %v3204_v23 = vadd.f32 %v1360_v16, %v3792_v36  ;;  %1846 = vmatpush.msra.mxu0 %v1718_v49  ;;  %v1066_v49 = vadd.f32 %v938_v6, %v420_v28 }
 0x209   :  { %v1712_v16 = vmax.f32 %v1584_v2, 0.0  ;;  %v1064_v30 = vadd.f32 %v936_v13, %v418_v38  ;;  %v1149_v36 = vadd.f32 %v1021_v55, %v503_v39  ;;  %v961_v13 = vmul.f32 %v2446_v12, %v2595_v45  ;;  %v3799_v55 = vld [vmem:[#allocation8_spill] sm:$0xff] }
 0x20a   :  { %3790 = vst [vmem:[#allocation10_spill] sm:$0xff] %v3198_v40  ;;  %1847 = vmatpush.msra.mxu0 %v1716_v8  ;;  %v1578_v18 = vadd.f32 %v3009_v0, %v1066_v49  ;;  %v3798_v8 = vld [vmem:[#allocation53_spill] sm:$0xff]  ;;  %v1708_v0 = vmax.f32 %v2920_v14, 0.0  ;;  %v443_v46 = vmul.f32 %v2442_v17, %v3799_v55  ;;  %v1024_v14 = vmul.f32 %v2444_v32, %v2422_v7  ;;  %v3801_v7 = vld [vmem:[#allocation100_spill] sm:$0xff]  ;;  %v3808_v55 = vld [vmem:[#allocation79_spill] sm:$0xff] }
 0x20b   :  { %v1576_v25 = vadd.f32 %v2877_v34, %v1064_v30  ;;  %v435_v45 = vmul.f32 %v2442_v17, %v2296_v53  ;;  %v502_v30 = vmul.f32 %v2440_v62, %v3796_v10 }
 0x20c   :  { %1848 = vmatpush.msra.mxu0 %v1714_v63  ;;  %v1706_v28 = vmax.f32 %v1578_v18, 0.0  ;;  %v959_v63 = vmul.f32 %v2446_v12, %v2294_v52  ;;  %v1089_v49 = vadd.f32 %v961_v13, %v443_v46  ;;  %v1020_v52 = vmul.f32 %v2444_v32, %v3795_v20  ;;  %v3806_v13 = vld [vmem:[#allocation78_spill] sm:$0xff] }
 0x20e   :  { %v1570_v22 = vpop.permute.xlu0 %1569  ;;  %1849 = vmatpush.msra.mxu0 %v1712_v16  ;;  %v1601_v53 = vadd.f32 %v3049_v60, %v1089_v49 }
 0x20f   :  { %v3219_v40 = vadd.f32 %v1570_v22, %v2927_v59  ;;  %v1475_v50 = vpop.permute.xlu2 %1474  ;;  %v3221_v31 = vpop.permute.xlu1 %1374  ;;  %v1698_v5 = vadd.f32 %v1570_v22, %v2929_v54  ;;  %v441_v59 = vmul.f32 %v2442_v17, %v2311_v58  ;;  %v506_v54 = vmul.f32 %v2440_v62, %v2435_v24  ;;  %v3800_v24 = vld [vmem:[#allocation49_spill] sm:$0xff] }
 0x210   :  { %v3225_v6 = vadd.f32 %v1475_v50, %v1149_v36  ;;  %v3229_v2 = vadd.f32 %v3221_v31, %v3798_v8  ;;  %1850 = vmatpush.msra.mxu0 %v1710_v43  ;;  %v1704_v58 = vmax.f32 %v1576_v25, 0.0  ;;  %v1603_v16 = vadd.f32 %v3113_v41, %v3800_v24  ;;  %v3802_v43 = vld [vmem:[#allocation35_spill] sm:$0xff]  ;;  %v3803_v25 = vld [vmem:[#allocation97_spill] sm:$0xff] }
 0x211   :  { %3797 = vst [vmem:[#allocation46_spill] sm:$0xff] %v3219_v40  ;;  %v1826_v38 = vmax.f32 %v1698_v5, 0.0  ;;  %v1087_v39 = vadd.f32 %v959_v63, %v441_v59  ;;  %v1152_v18 = vadd.f32 %v1024_v14, %v506_v54  ;;  %v1702_v36 = vmax.f32 %v3801_v7, 0.0  ;;  %v3807_v54 = vld [vmem:[#allocation95_spill] sm:$0xff]  ;;  %v3810_v24 = vld [vmem:[#allocation33_spill] sm:$0xff] }
 0x212   :  { %1851 = vmatpush.msra.mxu0 %v1708_v0  ;;  %v500_v5 = vmul.f32 %v2440_v62, %v3802_v43  ;;  %v3804_v0 = vld [vmem:[#allocation98_spill] sm:$0xff]  ;;  %v3809_v63 = vld [vmem:[#allocation27_spill] sm:$0xff]  ;;  %v1731_v49 = vmax.f32 %v1603_v16, 0.0 }
 0x213   :  { %1900 = vmatpush.msra.mxu3 %v1826_v38  ;;  %v1664_v20 = vadd.f32 %v3159_v11, %v1152_v18  ;;  %v476_v60 = vmul.f32 %v2440_v62, %v3809_v63  ;;  %v1599_v14 = vadd.f32 %v3007_v61, %v1087_v39  ;;  %v3811_v7 = vld [vmem:[#allocation71_spill] sm:$0xff]  ;;  %v1148_v18 = vadd.f32 %v1020_v52, %v502_v30 }
 0x214   :  { %1852 = vmatpush.msra.mxu0 %v1706_v28  ;;  %v1700_v28 = vmax.f32 %v3807_v54, 0.0  ;;  %v1662_v11 = vadd.f32 %v3192_v56, %v3811_v7  ;;  %v1729_v61 = vmax.f32 %v1601_v53, 0.0  ;;  %v3813_v39 = vld [vmem:[#allocation23_spill] sm:$0xff]  ;;  %v947_v56 = vmul.f32 %v2446_v12, %v2264_v42 }
 0x215   :  { %v994_v16 = vmul.f32 %v2444_v32, %v3813_v39  ;;  %v1792_v54 = vmax.f32 %v1664_v20, 0.0  ;;  %v1727_v52 = vmax.f32 %v1599_v14, 0.0  ;;  %v3815_v20 = vld [vmem:[#allocation45_spill] sm:$0xff] }
 0x216   :  { %v1565_v22 = vpop.permute.xlu0 %1564  ;;  %1853 = vmatpush.msra.mxu0 %v1704_v58  ;;  %v1790_v53 = vmax.f32 %v1662_v11, 0.0 }
 0x217   :  { %v1696_v8 = vadd.f32 %v1565_v22, %v3803_v25  ;;  %v3258_v41 = vadd.f32 %v1565_v22, %v3804_v0  ;;  %v3260_v59 = vpop.permute.xlu2 %1469  ;;  %v1490_v10 = vpop.permute.xlu1 %1489  ;;  %v1018_v22 = vmul.f32 %v2444_v32, %v3810_v24  ;;  %v953_v25 = vmul.f32 %v2446_v12, %v2279_v47  ;;  %v3812_v0 = vld [vmem:[#allocation48_spill] sm:$0xff] }
 0x218   :  { %v3264_v38 = vadd.f32 %v1490_v10, %v3806_v13  ;;  %1854 = vmatpush.msra.mxu0 %v1702_v36  ;;  %v1666_v46 = vadd.f32 %v1490_v10, %v3808_v55  ;;  %v1597_v10 = vadd.f32 %v3078_v26, %v3812_v0  ;;  %v429_v47 = vmul.f32 %v2442_v17, %v2281_v48 }
 0x219   :  { %3805 = vst [vmem:[#allocation72_spill] sm:$0xff] %v3258_v41  ;;  %v1824_v58 = vmax.f32 %v1696_v8, 0.0  ;;  %v1660_v8 = vadd.f32 %v1475_v50, %v1148_v18  ;;  %v1146_v13 = vadd.f32 %v1018_v22, %v500_v5  ;;  %v1081_v30 = vadd.f32 %v953_v25, %v435_v45  ;;  %v3814_v5 = vld [vmem:[#allocation44_spill] sm:$0xff]  ;;  %v3818_v22 = vld [vmem:[#allocation69_spill] sm:$0xff] }
 0x21a   :  { %1855 = vmatpush.msra.mxu0 %v1700_v28  ;;  %v1794_v36 = vmax.f32 %v1666_v46, 0.0  ;;  %v1122_v55 = vadd.f32 %v994_v16, %v476_v60  ;;  %v1725_v14 = vmax.f32 %v1597_v10, 0.0  ;;  %v3821_v25 = vld [vmem:[#allocation104_spill] sm:$0xff] }
 0x21b   :  { %1901 = vmatpush.msra.mxu3 %v1824_v58  ;;  %v1658_v26 = vadd.f32 %v3260_v59, %v1146_v13  ;;  %v1593_v50 = vadd.f32 %v2977_v1, %v1081_v30  ;;  %v1788_v11 = vmax.f32 %v1660_v8, 0.0  ;;  %v3820_v1 = vld [vmem:[#allocation47_spill] sm:$0xff]  ;;  %v1723_v0 = vmax.f32 %v3821_v25, 0.0 }
 0x21c   :  { %1920 = vmatpush.msrb.mxu0 %v1731_v49  ;;  %1880 = vmatpush.msra.mxu2 %v1794_v36  ;;  %v3817_v49 = vld [vmem:[#allocation68_spill] sm:$0xff]  ;;  %v1591_v18 = vadd.f32 %v3053_v19, %v3820_v1  ;;  %v1075_v30 = vadd.f32 %v947_v56, %v429_v47 }
 0x21d   :  { %v1721_v8 = vmax.f32 %v1593_v50, 0.0  ;;  %v3824_v47 = vld [vmem:[#allocation88_spill] sm:$0xff]  ;;  %v3825_v50 = vld [vmem:[#allocation89_spill] sm:$0xff] }
 0x21e   :  { %1921 = vmatpush.msrb.mxu0 %v1729_v61  ;;  %v1560_v28 = vpop.permute.xlu0 %1559  ;;  %1881 = vmatpush.msra.mxu2 %v1792_v54  ;;  %v3822_v61 = vld [vmem:[#allocation70_spill] sm:$0xff]  ;;  %v1786_v54 = vmax.f32 %v1658_v26, 0.0 }
 0x21f   :  { %v1694_v46 = vadd.f32 %v1560_v28, %v3814_v5  ;;  %v3289_v58 = vadd.f32 %v1560_v28, %v3815_v20  ;;  %v1465_v42 = vpop.permute.xlu2 %1464  ;;  %v3291_v45 = vpop.permute.xlu1 %1409  ;;  %v1014_v16 = vmul.f32 %v2444_v32, %v3822_v61  ;;  %v1015_v10 = vmul.f32 %v2446_v12, %v3822_v61  ;;  %v3830_v61 = vld [vmem:[#allocation58_spill] sm:$0xff] }
 0x220   :  { %1922 = vmatpush.msrb.mxu0 %v1727_v52  ;;  %v1656_v48 = vadd.f32 %v1465_v42, %v3817_v49  ;;  %v3295_v7 = vadd.f32 %v1465_v42, %v3818_v22  ;;  %1882 = vmatpush.msra.mxu2 %v1790_v53  ;;  %v1634_v60 = vadd.f32 %v3291_v45, %v1122_v55  ;;  %v3823_v52 = vld [vmem:[#allocation25_spill] sm:$0xff]  ;;  %v1719_v5 = vmax.f32 %v1591_v18, 0.0  ;;  %v3827_v22 = vld [vmem:[#allocation102_spill] sm:$0xff] }
 0x221   :  { %3816 = vst [vmem:[#allocation50_spill] sm:$0xff] %v3289_v58  ;;  %v1822_v36 = vmax.f32 %v1694_v46, 0.0  ;;  %v496_v19 = vmul.f32 %v2440_v62, %v3823_v52  ;;  %v497_v28 = vmul.f32 %v2442_v17, %v3823_v52  ;;  %v1587_v55 = vadd.f32 %v2947_v27, %v1075_v30  ;;  %v3829_v27 = vld [vmem:[#allocation56_spill] sm:$0xff] }
 0x222   :  { %3819 = vst [vmem:[#allocation51_spill] sm:$0xff] %v3295_v7  ;;  %1923 = vmatpush.msrb.mxu0 %v1725_v14  ;;  %1883 = vmatpush.msra.mxu2 %v1788_v11  ;;  %v1762_v13 = vmax.f32 %v1634_v60, 0.0  ;;  %v1784_v53 = vmax.f32 %v1656_v48, 0.0  ;;  %v1717_v11 = vmax.f32 %v3827_v22, 0.0  ;;  %v937_v18 = vmul.f32 %v2446_v12, %v3793_v51  ;;  %v3838_v22 = vld [vmem:[#allocation85_spill] sm:$0xff] }
 0x223   :  { %1902 = vmatpush.msra.mxu3 %v1822_v36  ;;  %v1142_v26 = vadd.f32 %v1014_v16, %v496_v19  ;;  %v1143_v56 = vadd.f32 %v1015_v10, %v497_v28  ;;  %v419_v36 = vmul.f32 %v2442_v17, %v3794_v3  ;;  %v990_v16 = vmul.f32 %v2444_v32, %v3830_v61  ;;  %v3833_v3 = vld [vmem:[#allocation99_spill] sm:$0xff]  ;;  %v3876_v7 = vld [vmem:[#allocation29_spill] sm:$0xff] }
 0x224   :  { %1924 = vmatpush.msrb.mxu0 %v1723_v0  ;;  %1860 = vmatpush.msra.mxu1 %v1762_v13  ;;  %v1715_v0 = vmax.f32 %v1587_v55, 0.0  ;;  %v1711_v19 = vmax.f32 %v3833_v3, 0.0  ;;  %v1746_v58 = vmax.f32 %v3155_v37, 0.0  ;;  %v477_v37 = vmul.f32 %v2442_v17, %v3809_v63 }
 0x225   :  { %1884 = vmatpush.msra.mxu2 %v1786_v54  ;;  %v3831_v54 = vld [vmem:[#allocation106_spill] sm:$0xff]  ;;  %v1065_v51 = vadd.f32 %v937_v18, %v419_v36  ;;  %v3841_v18 = vld [vmem:[#allocation24_spill] sm:$0xff]  ;;  %v995_v63 = vmul.f32 %v2446_v12, %v3813_v39 }
 0x226   :  { %1925 = vmatpush.msrb.mxu0 %v1721_v8  ;;  %v1555_v46 = vpop.permute.xlu0 %1554  ;;  %v1713_v30 = vmax.f32 %v3831_v54, 0.0  ;;  %v3832_v8 = vld [vmem:[#allocation13_spill] sm:$0xff]  ;;  %v470_v36 = vmul.f32 %v2440_v62, %v3841_v18  ;;  %v3878_v39 = vld [vmem:[#allocation64_spill] sm:$0xff] }
 0x227   :  { %1885 = vmatpush.msra.mxu2 %v1784_v53  ;;  %v1692_v20 = vadd.f32 %v1555_v46, %v3824_v47  ;;  %v3312_v42 = vadd.f32 %v1555_v46, %v3825_v50  ;;  %v1460_v14 = vpop.permute.xlu2 %1459  ;;  %v3314_v49 = vpop.permute.xlu1 %1404  ;;  %v472_v52 = vmul.f32 %v2440_v62, %v3832_v8  ;;  %v1577_v55 = vadd.f32 %v2877_v34, %v1065_v51  ;;  %v3837_v50 = vld [vmem:[#allocation92_spill] sm:$0xff] }
 0x228   :  { %1926 = vmatpush.msrb.mxu0 %v1719_v5  ;;  %v1654_v48 = vadd.f32 %v1460_v14, %v1142_v26  ;;  %v3317_v60 = vadd.f32 %v1460_v14, %v1143_v56  ;;  %v1632_v1 = vadd.f32 %v3314_v49, %v3829_v27  ;;  %v3834_v5 = vld [vmem:[#allocation93_spill] sm:$0xff]  ;;  %v3835_v26 = vld [vmem:[#allocation94_spill] sm:$0xff]  ;;  %v1709_v14 = vmax.f32 %v3837_v50, 0.0  ;;  %v3844_v51 = vld [vmem:[#allocation84_spill] sm:$0xff] }
 0x229   :  { %3826 = vst [vmem:[#allocation6_spill] sm:$0xff] %v3312_v42  ;;  %v1820_v25 = vmax.f32 %v1692_v20, 0.0  ;;  %v1118_v53 = vadd.f32 %v990_v16, %v472_v52  ;;  %v3842_v16 = vld [vmem:[#allocation20_spill] sm:$0xff] }
 0x22a   :  { %3828 = vst [vmem:[#allocation7_spill] sm:$0xff] %v3317_v60  ;;  %1927 = vmatpush.msrb.mxu0 %v1717_v11  ;;  %v1760_v10 = vmax.f32 %v1632_v1, 0.0  ;;  %v1782_v13 = vmax.f32 %v1654_v48, 0.0  ;;  %v3840_v1 = vld [vmem:[#allocation103_spill] sm:$0xff] }
 0x22b   :  { %1903 = vmatpush.msra.mxu3 %v1820_v25  ;;  %v1707_v34 = vmax.f32 %v3840_v1, 0.0  ;;  %v3849_v1 = vld [vmem:[#allocation21_spill] sm:$0xff] }
 0x22c   :  { %1928 = vmatpush.msrb.mxu0 %v1715_v0  ;;  %1861 = vmatpush.msra.mxu1 %v1760_v10  ;;  %v1705_v0 = vmax.f32 %v1577_v55, 0.0  ;;  %v988_v10 = vmul.f32 %v2444_v32, %v3842_v16  ;;  %v3848_v55 = vld [vmem:[#allocation96_spill] sm:$0xff] }
 0x22d   :  { %1886 = vmatpush.msra.mxu2 %v1782_v13  ;;  %v3843_v13 = vld [vmem:[#allocation101_spill] sm:$0xff] }
 0x22e   :  { %1929 = vmatpush.msrb.mxu0 %v1713_v30  ;;  %v1550_v28 = vpop.permute.xlu0 %1549  ;;  %v1703_v54 = vmax.f32 %v3843_v13, 0.0  ;;  %v1116_v52 = vadd.f32 %v988_v10, %v470_v36  ;;  %v3850_v36 = vld [vmem:[#allocation17_spill] sm:$0xff] }
 0x22f   :  { %v1690_v46 = vadd.f32 %v1550_v28, %v3834_v5  ;;  %v3334_v56 = vadd.f32 %v1550_v28, %v3835_v26  ;;  %v1540_v47 = vpop.permute.xlu2 %1539  ;;  %v3336_v20 = vpop.permute.xlu1 %1399  ;;  %v1701_v26 = vmax.f32 %v3848_v55, 0.0 }
 0x230   :  { %1930 = vmatpush.msrb.mxu0 %v1711_v19  ;;  %v3340_v11 = vadd.f32 %v1540_v47, %v3838_v22  ;;  %v1630_v48 = vadd.f32 %v3336_v20, %v1118_v53  ;;  %v1686_v3 = vadd.f32 %v1540_v47, %v3844_v51  ;;  %v3845_v19 = vld [vmem:[#allocation42_spill] sm:$0xff]  ;;  %v3846_v53 = vld [vmem:[#allocation43_spill] sm:$0xff]  ;;  %v984_v22 = vmul.f32 %v2444_v32, %v2663_v29 }
 0x231   :  { %3836 = vst [vmem:[#allocation73_spill] sm:$0xff] %v3334_v56  ;;  %v1818_v27 = vmax.f32 %v1690_v46, 0.0  ;;  %v3854_v51 = vld [vmem:[#allocation18_spill] sm:$0xff] }
 0x232   :  { %3839 = vst [vmem:[#allocation28_spill] sm:$0xff] %v3340_v11  ;;  %1931 = vmatpush.msrb.mxu0 %v1709_v14  ;;  %v1758_v25 = vmax.f32 %v1630_v48, 0.0  ;;  %v1814_v47 = vmax.f32 %v1686_v3, 0.0  ;;  %v458_v3 = vmul.f32 %v2440_v62, %v3854_v51 }
 0x233   :  { %1904 = vmatpush.msra.mxu3 %v1818_v27  ;;  %v466_v27 = vmul.f32 %v2440_v62, %v3787_v21 }
 0x234   :  { %1932 = vmatpush.msrb.mxu0 %v1707_v34  ;;  %1862 = vmatpush.msra.mxu1 %v1758_v25  ;;  %v464_v34 = vmul.f32 %v2440_v62, %v3849_v1  ;;  %v982_v25 = vmul.f32 %v2444_v32, %v3850_v36 }
 0x236   :  { %1933 = vmatpush.msrb.mxu0 %v1705_v0  ;;  %v1545_v30 = vpop.permute.xlu0 %1544  ;;  %v1112_v0 = vadd.f32 %v984_v22, %v466_v27  ;;  %v3859_v27 = vld [vmem:[#allocation67_spill] sm:$0xff] }
 0x237   :  { %v1688_v28 = vadd.f32 %v1545_v30, %v3845_v19  ;;  %v3352_v5 = vadd.f32 %v1545_v30, %v3846_v53  ;;  %v3354_v46 = vpop.permute.xlu1 %1394  ;;  %v3368_v13 = vpop.permute.xlu2 %1444  ;;  %v3855_v19 = vld [vmem:[#allocation34_spill] sm:$0xff] }
 0x238   :  { %1934 = vmatpush.msrb.mxu0 %v1703_v54  ;;  %v1628_v50 = vadd.f32 %v3354_v46, %v1116_v52  ;;  %3852 = vst [vmem:[#allocation49_spill] sm:$0xff] %v3368_v13  ;;  %v1110_v54 = vadd.f32 %v982_v25, %v464_v34  ;;  %v1624_v30 = vadd.f32 %v3185_v33, %v1112_v0  ;;  %v3853_v52 = vld [vmem:[#allocation54_spill] sm:$0xff] }
 0x239   :  { %3847 = vst [vmem:[#allocation53_spill] sm:$0xff] %v3352_v5  ;;  %v1816_v14 = vmax.f32 %v1688_v28, 0.0  ;;  %v494_v28 = vmul.f32 %v2440_v62, %v3855_v19  ;;  %v1008_v34 = vmul.f32 %v2444_v32, %v3859_v27  ;;  %v3862_v5 = vld [vmem:[#allocation22_spill] sm:$0xff] }
 0x23a   :  { %1935 = vmatpush.msrb.mxu0 %v1701_v26  ;;  %v1756_v48 = vmax.f32 %v1628_v50, 0.0  ;;  %v1622_v53 = vadd.f32 %v3111_v44, %v1110_v54  ;;  %v3856_v26 = vld [vmem:[#allocation14_spill] sm:$0xff]  ;;  %v490_v56 = vmul.f32 %v2440_v62, %v3862_v5 }
 0x23b   :  { %1905 = vmatpush.msra.mxu3 %v1816_v14  ;;  %v976_v50 = vmul.f32 %v2444_v32, %v3856_v26  ;;  %v3857_v14 = vld [vmem:[#allocation31_spill] sm:$0xff] }
 0x23c   :  { %1863 = vmatpush.msra.mxu1 %v1756_v48  ;;  %v1012_v22 = vmul.f32 %v2444_v32, %v3857_v14  ;;  %v3858_v48 = vld [vmem:[#allocation52_spill] sm:$0xff] }
 0x23d   :  { %1906 = vmatpush.msra.mxu3 %v1814_v47  ;;  %v1620_v33 = vadd.f32 %v3221_v31, %v3858_v48  ;;  %v1752_v47 = vmax.f32 %v1624_v30, 0.0  ;;  %v1104_v25 = vadd.f32 %v976_v50, %v458_v3  ;;  %v3864_v31 = vld [vmem:[#allocation110_spill] sm:$0xff]  ;;  %v3865_v30 = vld [vmem:[#allocation65_spill] sm:$0xff] }
 0x23e   :  { %v3366_v10 = vpop.permute.xlu0 %1449  ;;  %v1140_v54 = vadd.f32 %v1012_v22, %v494_v28 }
 0x23f   :  { %3851 = vst [vmem:[#allocation8_spill] sm:$0xff] %v3366_v10  ;;  %v3370_v29 = vpop.permute.xlu1 %1389  ;;  %v1650_v48 = vadd.f32 %v3366_v10, %v3865_v30  ;;  %v1748_v50 = vmax.f32 %v1620_v33, 0.0  ;;  %v3400_v28 = vpop.permute.xlu2 %1524 }
 0x240   :  { %v1626_v21 = vadd.f32 %v3370_v29, %v3853_v52  ;;  %v1750_v52 = vmax.f32 %v1622_v53, 0.0  ;;  %3866 = vst [vmem:[#allocation97_spill] sm:$0xff] %v3400_v28  ;;  %v3867_v53 = vld [vmem:[#allocation11_spill] sm:$0xff] }
 0x241   :  { %v970_v22 = vmul.f32 %v2444_v32, %v3867_v53  ;;  %v1778_v60 = vmax.f32 %v1650_v48, 0.0 }
 0x242   :  { %v1754_v55 = vmax.f32 %v1626_v21, 0.0  ;;  %v3861_v21 = vld [vmem:[#allocation15_spill] sm:$0xff] }
 0x243   :  { %v452_v11 = vmul.f32 %v2440_v62, %v3861_v21 }
 0x244   :  { %1864 = vmatpush.msra.mxu1 %v1754_v55  ;;  %v1616_v55 = vadd.f32 %v3864_v31, %v1104_v25 }
 0x245   :  { %v1098_v25 = vadd.f32 %v970_v22, %v452_v11 }
 0x246   :  { %v3388_v0 = vpop.permute.xlu0 %1529  ;;  %1865 = vmatpush.msra.mxu1 %v1752_v47  ;;  %v1136_v47 = vadd.f32 %v1008_v34, %v490_v56  ;;  %v1744_v30 = vmax.f32 %v1616_v55, 0.0  ;;  %v3869_v56 = vld [vmem:[#allocation107_spill] sm:$0xff]  ;;  %v3872_v55 = vld [vmem:[#allocation40_spill] sm:$0xff] }
 0x247   :  { %3860 = vst [vmem:[#allocation100_spill] sm:$0xff] %v3388_v0  ;;  %v3394_v42 = vpop.permute.xlu1 %1454  ;;  %v1610_v34 = vadd.f32 %v3869_v56, %v1098_v25  ;;  %v1682_v48 = vadd.f32 %v3388_v0, %v3872_v55  ;;  %v3875_v25 = vld [vmem:[#allocation32_spill] sm:$0xff]  ;;  %v1006_v55 = vmul.f32 %v2444_v32, %v3876_v7 }
 0x248   :  { %3863 = vst [vmem:[#allocation35_spill] sm:$0xff] %v3394_v42  ;;  %v1652_v3 = vadd.f32 %v3394_v42, %v1140_v54  ;;  %1866 = vmatpush.msra.mxu1 %v1750_v52  ;;  %v1648_v40 = vadd.f32 %v3368_v13, %v1136_v47  ;;  %v3868_v54 = vld [vmem:[#allocation12_spill] sm:$0xff]  ;;  %v1742_v52 = vmax.f32 %v3201_v15, 0.0  ;;  %v3873_v47 = vld [vmem:[#allocation90_spill] sm:$0xff]  ;;  %v3879_v42 = vld [vmem:[#allocation105_spill] sm:$0xff] }
 0x249   :  { %v446_v33 = vmul.f32 %v2440_v62, %v3868_v54  ;;  %v1738_v13 = vmax.f32 %v1610_v34, 0.0  ;;  %v3877_v0 = vld [vmem:[#allocation80_spill] sm:$0xff]  ;;  %v1736_v34 = vmax.f32 %v3165_v35, 0.0  ;;  %v989_v35 = vmul.f32 %v2446_v12, %v3842_v16 }
 0x24a   :  { %1867 = vmatpush.msra.mxu1 %v1748_v50  ;;  %v1780_v41 = vmax.f32 %v1652_v3, 0.0 }
 0x24c   :  { %1868 = vmatpush.msra.mxu1 %v1746_v58  ;;  %1887 = vmatpush.msra.mxu2 %v1780_v41  ;;  %v1776_v58 = vmax.f32 %v1648_v40, 0.0  ;;  %v3871_v41 = vld [vmem:[#allocation9_spill] sm:$0xff] }
 0x24d   :  { %v964_v11 = vmul.f32 %v2444_v32, %v3871_v41 }
 0x24e   :  { %1869 = vmatpush.msra.mxu1 %v1744_v30  ;;  %1888 = vmatpush.msra.mxu2 %v1778_v60  ;;  %v3412_v3 = vpop.permute.xlu0 %1434  ;;  %v3874_v60 = vld [vmem:[#allocation111_spill] sm:$0xff]  ;;  %v488_v30 = vmul.f32 %v2440_v62, %v3875_v25 }
 0x24f   :  { %v3414_v50 = vpop.permute.xlu1 %1534  ;;  %v1740_v15 = vmax.f32 %v3874_v60, 0.0  ;;  %v1092_v40 = vadd.f32 %v964_v11, %v446_v33  ;;  %v1680_v60 = vadd.f32 %v3400_v28, %v3877_v0  ;;  %v1810_v11 = vmax.f32 %v1682_v48, 0.0 }
 0x250   :  { %3870 = vst [vmem:[#allocation98_spill] sm:$0xff] %v3414_v50  ;;  %v1684_v22 = vadd.f32 %v3414_v50, %v3873_v47  ;;  %1870 = vmatpush.msra.mxu1 %v1742_v52  ;;  %1889 = vmatpush.msra.mxu2 %v1776_v58  ;;  %v991_v47 = vmul.f32 %v2446_v12, %v3830_v61  ;;  %v3433_v50 = vpop.permute.xlu2 %1429 }
 0x251   :  { %v1123_v52 = vadd.f32 %v995_v63, %v477_v37  ;;  %v1002_v58 = vmul.f32 %v2444_v32, %v3878_v39  ;;  %v1604_v33 = vadd.f32 %v3879_v42, %v1092_v40  ;;  %v471_v61 = vmul.f32 %v2442_v17, %v3841_v18  ;;  %v3880_v37 = vld [vmem:[#allocation19_spill] sm:$0xff]  ;;  %v3881_v40 = vld [vmem:[#allocation108_spill] sm:$0xff] }
 0x252   :  { %1871 = vmatpush.msra.mxu1 %v1740_v15  ;;  %v1812_v10 = vmax.f32 %v1684_v22, 0.0  ;;  %v473_v22 = vmul.f32 %v2442_v17, %v3832_v8  ;;  %v484_v15 = vmul.f32 %v2440_v62, %v3880_v37  ;;  %v1134_v63 = vadd.f32 %v1006_v55, %v488_v30 }
 0x253   :  { %v1635_v0 = vadd.f32 %v3291_v45, %v1123_v52  ;;  %v1808_v18 = vmax.f32 %v1680_v60, 0.0  ;;  %v3883_v45 = vld [vmem:[#allocation62_spill] sm:$0xff]  ;;  %v1732_v30 = vmax.f32 %v1604_v33, 0.0  ;;  %v465_v60 = vmul.f32 %v2442_v17, %v3849_v1 }
 0x254   :  { %1872 = vmatpush.msra.mxu1 %v1738_v13  ;;  %1907 = vmatpush.msra.mxu3 %v1812_v10  ;;  %v1734_v13 = vmax.f32 %v3881_v40, 0.0  ;;  %v3882_v10 = vld [vmem:[#allocation57_spill] sm:$0xff]  ;;  %v1119_v8 = vadd.f32 %v991_v47, %v473_v22  ;;  %v1130_v39 = vadd.f32 %v1002_v58, %v484_v15  ;;  %v1644_v52 = vadd.f32 %v3412_v3, %v3883_v45  ;;  %v3887_v45 = vld [vmem:[#allocation30_spill] sm:$0xff] }
 0x255   :  { %v1633_v48 = vadd.f32 %v3314_v49, %v3882_v10  ;;  %v1763_v16 = vmax.f32 %v1635_v0, 0.0 }
 0x256   :  { %1873 = vmatpush.msra.mxu1 %v1736_v34  ;;  %1908 = vmatpush.msra.mxu3 %v1810_v11  ;;  %v1631_v55 = vadd.f32 %v3336_v20, %v1119_v8  ;;  %v1117_v11 = vadd.f32 %v989_v35, %v471_v61  ;;  %v3457_v40 = vpop.permute.xlu0 %1514  ;;  %v1642_v49 = vadd.f32 %v3433_v50, %v1130_v39  ;;  %v1772_v33 = vmax.f32 %v1644_v52, 0.0  ;;  %v3884_v61 = vld [vmem:[#allocation55_spill] sm:$0xff]  ;;  %v3885_v35 = vld [vmem:[#allocation38_spill] sm:$0xff] }
 0x257   :  { %v3451_v28 = vpop.permute.xlu1 %1439  ;;  %v1761_v22 = vmax.f32 %v1633_v48, 0.0  ;;  %v983_v20 = vmul.f32 %v2446_v12, %v3850_v36  ;;  %v1627_v15 = vadd.f32 %v3370_v29, %v3884_v61  ;;  %v1676_v10 = vadd.f32 %v3457_v40, %v3885_v35  ;;  %v3886_v48 = vld [vmem:[#allocation86_spill] sm:$0xff]  ;;  %v3892_v35 = vld [vmem:[#allocation59_spill] sm:$0xff] }
 0x258   :  { %v1646_v34 = vadd.f32 %v3451_v28, %v1134_v63  ;;  %1874 = vmatpush.msra.mxu1 %v1734_v13  ;;  %1909 = vmatpush.msra.mxu3 %v1808_v18  ;;  %v1629_v58 = vadd.f32 %v3354_v46, %v1117_v11  ;;  %v3467_v0 = vpop.permute.xlu2 %1509  ;;  %v1759_v39 = vmax.f32 %v1631_v55, 0.0  ;;  %v1770_v63 = vmax.f32 %v1642_v49, 0.0 }
 0x259   :  { %v1111_v13 = vadd.f32 %v983_v20, %v465_v60  ;;  %v459_v29 = vmul.f32 %v2442_v17, %v3854_v51  ;;  %v1755_v18 = vmax.f32 %v1627_v15, 0.0  ;;  %v482_v52 = vmul.f32 %v2440_v62, %v3887_v45  ;;  %v3889_v51 = vld [vmem:[#allocation26_spill] sm:$0xff]  ;;  %v3891_v20 = vld [vmem:[#allocation16_spill] sm:$0xff] }
 0x25a   :  { %1875 = vmatpush.msra.mxu1 %v1732_v30  ;;  %v1774_v47 = vmax.f32 %v1646_v34, 0.0  ;;  %v1757_v46 = vmax.f32 %v1629_v58, 0.0  ;;  %v3888_v34 = vld [vmem:[#allocation76_spill] sm:$0xff]  ;;  %v977_v11 = vmul.f32 %v2446_v12, %v3856_v26  ;;  %v1753_v49 = vmax.f32 %v3190_v57, 0.0 }
 0x25b   :  { %v1623_v8 = vadd.f32 %v3111_v44, %v1111_v13  ;;  %v1674_v30 = vadd.f32 %v3467_v0, %v3888_v34  ;;  %v1000_v44 = vmul.f32 %v2444_v32, %v3889_v51  ;;  %v1804_v58 = vmax.f32 %v1676_v10, 0.0 }
 0x25c   :  { %1940 = vmatpush.msrb.mxu1 %v1763_v16  ;;  %1890 = vmatpush.msra.mxu2 %v1774_v47  ;;  %v3890_v47 = vld [vmem:[#allocation61_spill] sm:$0xff]  ;;  %v478_v61 = vmul.f32 %v2440_v62, %v3891_v20  ;;  %v453_v57 = vmul.f32 %v2442_v17, %v3861_v21  ;;  %v1747_v21 = vmax.f32 %v3157_v4, 0.0  ;;  %v1743_v4 = vmax.f32 %v3204_v23, 0.0  ;;  %v3895_v23 = vld [vmem:[#allocation82_spill] sm:$0xff] }
 0x25d   :  { %v996_v60 = vmul.f32 %v2444_v32, %v3890_v47  ;;  %v1128_v26 = vadd.f32 %v1000_v44, %v482_v52  ;;  %v1802_v15 = vmax.f32 %v1674_v30, 0.0  ;;  %v1749_v32 = vmax.f32 %v3229_v2, 0.0 }
 0x25e   :  { %1941 = vmatpush.msrb.mxu1 %v1761_v22  ;;  %1891 = vmatpush.msra.mxu2 %v1772_v33  ;;  %v3484_v16 = vpop.permute.xlu0 %1419  ;;  %v1105_v22 = vadd.f32 %v977_v11, %v459_v29  ;;  %v1751_v33 = vmax.f32 %v1623_v8, 0.0  ;;  %v447_v2 = vmul.f32 %v2442_v17, %v3868_v54  ;;  %v501_v52 = vmul.f32 %v2442_v17, %v3802_v43 }
 0x25f   :  { %v3469_v1 = vpop.permute.xlu1 %1519  ;;  %v1638_v10 = vadd.f32 %v3484_v16, %v3892_v35  ;;  %v965_v30 = vmul.f32 %v2446_v12, %v3871_v41  ;;  %v1019_v54 = vmul.f32 %v2446_v12, %v3810_v24  ;;  %v3531_v41 = vld [vmem:[%s3628_s3] sm:$0xf] }
 0x260   :  { %1942 = vmatpush.msrb.mxu1 %v1759_v39  ;;  %v1678_v36 = vadd.f32 %v3469_v1, %v3886_v48  ;;  %1892 = vmatpush.msra.mxu2 %v1770_v63  ;;  %v1617_v39 = vadd.f32 %v3864_v31, %v1105_v22  ;;  %v3496_v63 = vpop.permute.xlu2 %1414  ;;  %v971_v48 = vmul.f32 %v2446_v12, %v3867_v53  ;;  %v3897_v35 = vld [vmem:[#allocation10_spill] sm:$0xff] }
 0x261   :  { %v1093_v44 = vadd.f32 %v965_v30, %v447_v2  ;;  %v1147_v24 = vadd.f32 %v1019_v54, %v501_v52  ;;  %v489_v2 = vmul.f32 %v2442_v17, %v3875_v25  ;;  %v491_v52 = vmul.f32 %v2442_v17, %v3862_v5  ;;  %v3905_v5 = vld [vmem:[#allocation46_spill] sm:$0xff] }
 0x262   :  { %1943 = vmatpush.msrb.mxu1 %v1757_v46  ;;  %v1806_v55 = vmax.f32 %v1678_v36, 0.0  ;;  %v1124_v46 = vadd.f32 %v996_v60, %v478_v61  ;;  %v1099_v29 = vadd.f32 %v971_v48, %v453_v57  ;;  %v1745_v8 = vmax.f32 %v1617_v39, 0.0  ;;  %v3894_v60 = vld [vmem:[#allocation36_spill] sm:$0xff] }
 0x263   :  { %v1793_v61 = vmax.f32 %v3162_v9, 0.0  ;;  %v1659_v39 = vadd.f32 %v3260_v59, %v1147_v24  ;;  %v1013_v9 = vmul.f32 %v2446_v12, %v3857_v14  ;;  %v3906_v24 = vld [vmem:[#allocation64_spill] sm:$0xff] }
 0x264   :  { %1944 = vmatpush.msrb.mxu1 %v1755_v18  ;;  %1910 = vmatpush.msra.mxu3 %v1806_v55  ;;  %v1636_v31 = vadd.f32 %v3496_v63, %v1124_v46  ;;  %v1766_v18 = vmax.f32 %v1638_v10, 0.0  ;;  %v1611_v34 = vadd.f32 %v3869_v56, %v1099_v29  ;;  %v1795_v56 = vmax.f32 %v3264_v38, 0.0 }
 0x265   :  { %v1834_v38 = vperm.slane %v3531_v41, 2  ;;  %v1791_v10 = vmax.f32 %v3897_v35, 0.0  ;;  %v1787_v14 = vmax.f32 %v1659_v39, 0.0  ;;  %v485_v39 = vmul.f32 %v2442_v17, %v3880_v37  ;;  %v3910_v37 = vld [vmem:[#allocation63_spill] sm:$0xff] }
 0x266   :  { %1945 = vmatpush.msrb.mxu1 %v1753_v49  ;;  %1911 = vmatpush.msra.mxu3 %v1804_v58  ;;  %v3513_v53 = vpop.permute.xlu0 %1499  ;;  %v1764_v55 = vmax.f32 %v1636_v31, 0.0  ;;  %v3893_v49 = vld [vmem:[#allocation112_spill] sm:$0xff]  ;;  %v1009_v31 = vmul.f32 %v2446_v12, %v3859_v27  ;;  %v3901_v27 = vld [vmem:[#allocation51_spill] sm:$0xff] }
 0x267   :  { %v3498_v13 = vpop.permute.xlu1 %1424  ;;  %v1741_v43 = vmax.f32 %v3893_v49, 0.0  ;;  %v1670_v58 = vadd.f32 %v3513_v53, %v3894_v60  ;;  %v1785_v30 = vmax.f32 %v3901_v27, 0.0  ;;  %v1835_v49 = vperm.slane %v3531_v41, 3  ;;  %v3904_v60 = vld [vmem:[#allocation7_spill] sm:$0xff] }
 0x268   :  { %1946 = vmatpush.msrb.mxu1 %v1751_v33  ;;  %v1640_v62 = vadd.f32 %v3498_v13, %v1128_v26  ;;  %1912 = vmatpush.msra.mxu3 %v1802_v15  ;;  %v1739_v33 = vmax.f32 %v1611_v34, 0.0  ;;  %v495_v26 = vmul.f32 %v2442_v17, %v3855_v19  ;;  %v1605_v15 = vadd.f32 %v3879_v42, %v1093_v44  ;;  %v3898_v42 = vld [vmem:[#allocation109_spill] sm:$0xff]  ;;  %v3900_v34 = vld [vmem:[#allocation35_spill] sm:$0xff] }
 0x269   :  { %v1798_v48 = vmax.f32 %v1670_v58, 0.0  ;;  %v1735_v59 = vmax.f32 %v3898_v42, 0.0  ;;  %v1789_v19 = vmax.f32 %v3225_v6, 0.0  ;;  %v1137_v25 = vadd.f32 %v1009_v31, %v491_v52 }
 0x26a   :  { %1947 = vmatpush.msrb.mxu1 %v1749_v32  ;;  %v1768_v36 = vmax.f32 %v1640_v62, 0.0  ;;  %v3896_v32 = vld [vmem:[#allocation113_spill] sm:$0xff]  ;;  %v1832_v62 = vperm.slane %v3531_v41, 0  ;;  %v1783_v58 = vmax.f32 %v3904_v60, 0.0 }
 0x26b   :  { %v1737_v46 = vmax.f32 %v3896_v32, 0.0  ;;  %v483_v32 = vmul.f32 %v2442_v17, %v3887_v45 }
 0x26c   :  { %1948 = vmatpush.msrb.mxu1 %v1747_v21  ;;  %1893 = vmatpush.msra.mxu2 %v1768_v36  ;;  %v1833_v21 = vperm.slane %v3531_v41, 1  ;;  %v1141_v36 = vadd.f32 %v1013_v9, %v495_v26  ;;  %v1001_v9 = vmul.f32 %v2446_v12, %v3889_v51  ;;  %v3912_v51 = vld [vmem:[#allocation73_spill] sm:$0xff] }
 0x26d   :  { %1856 = vmatmul.f32.vlgmr.msra.gmra.mxu0 %v1832_v62 }
 0x26e   :  { %1949 = vmatpush.msrb.mxu1 %v1745_v8  ;;  %1894 = vmatpush.msra.mxu2 %v1766_v18  ;;  %v1733_v8 = vmax.f32 %v1605_v15, 0.0  ;;  %v3899_v18 = vld [vmem:[#allocation74_spill] sm:$0xff]  ;;  %v3908_v15 = vld [vmem:[#allocation72_spill] sm:$0xff] }
 0x26f   :  { %v3520_v11 = vpop.permute.xlu1 %1504  ;;  %1876 = vmatmul.f32.vlgmr.msra.gmra.mxu1 %v1833_v21 }
 0x270   :  { %1950 = vmatpush.msrb.mxu1 %v1743_v4  ;;  %v1672_v22 = vadd.f32 %v3520_v11, %v3895_v23  ;;  %1895 = vmatpush.msra.mxu2 %v1764_v55  ;;  %v1653_v4 = vadd.f32 %v3900_v34, %v1141_v36  ;;  %v1007_v55 = vmul.f32 %v2446_v12, %v3876_v7  ;;  %v1827_v23 = vmax.f32 %v3905_v5, 0.0  ;;  %v3916_v34 = vld [vmem:[#allocation41_spill] sm:$0xff] }
 0x271   :  { %1896 = vmatmul.f32.vlgmr.msra.gmra.mxu2 %v1834_v38  ;;  %v1129_v36 = vadd.f32 %v1001_v9, %v483_v32 }
 0x272   :  { %1951 = vmatpush.msrb.mxu1 %v1741_v43  ;;  %1960 = vmatpush.msrb.mxu2 %v1795_v56  ;;  %v1800_v57 = vmax.f32 %v1672_v22, 0.0  ;;  %v3902_v43 = vld [vmem:[#allocation66_spill] sm:$0xff]  ;;  %v3903_v56 = vld [vmem:[#allocation8_spill] sm:$0xff]  ;;  %v1135_v22 = vadd.f32 %v1007_v55, %v489_v2  ;;  %v1781_v7 = vmax.f32 %v1653_v4, 0.0 }
 0x273   :  { %v1651_v44 = vadd.f32 %v3903_v56, %v3902_v43  ;;  %v3914_v2 = vld [vmem:[#allocation98_spill] sm:$0xff]  ;;  %v3917_v4 = vld [vmem:[#allocation100_spill] sm:$0xff]  ;;  %v3921_v43 = vld [vmem:[#allocation97_spill] sm:$0xff] }
 0x274   :  { %1952 = vmatpush.msrb.mxu1 %v1739_v33  ;;  %1961 = vmatpush.msrb.mxu2 %v1793_v61  ;;  %v1003_v33 = vmul.f32 %v2446_v12, %v3906_v24  ;;  %v3907_v61 = vld [vmem:[#allocation49_spill] sm:$0xff]  ;;  %v1683_v27 = vadd.f32 %v3917_v4, %v3916_v34 }
 0x275   :  { %1913 = vmatpush.msra.mxu3 %v1800_v57  ;;  %v1649_v26 = vadd.f32 %v3907_v61, %v1137_v25  ;;  %v1825_v57 = vmax.f32 %v3908_v15, 0.0  ;;  %1936 = vmatmul.f32.vlgmr.msrb.gmra.mxu0 %v1832_v62  ;;  %v1779_v35 = vmax.f32 %v1651_v44, 0.0  ;;  %v3920_v25 = vld [vmem:[#allocation81_spill] sm:$0xff] }
 0x276   :  { %1953 = vmatpush.msrb.mxu1 %v1737_v46  ;;  %1962 = vmatpush.msrb.mxu2 %v1791_v10  ;;  %v1647_v46 = vadd.f32 %v3451_v28, %v1135_v22  ;;  %v3909_v10 = vld [vmem:[#allocation50_spill] sm:$0xff]  ;;  %v1131_v42 = vadd.f32 %v1003_v33, %v485_v39  ;;  %v997_v28 = vmul.f32 %v2446_v12, %v3890_v47  ;;  %v3915_v12 = vld [vmem:[#allocation53_spill] sm:$0xff]  ;;  %v3923_v22 = vld [vmem:[#allocation39_spill] sm:$0xff] }
 0x277   :  { %1914 = vmatpush.msra.mxu3 %v1798_v48  ;;  %v3551_v29 = vpop.permute.xlu1 %1494  ;;  %v1823_v48 = vmax.f32 %v3909_v10, 0.0  ;;  %v1777_v62 = vmax.f32 %v1649_v26, 0.0  ;;  %v1817_v47 = vmax.f32 %v3915_v12, 0.0  ;;  %v1677_v24 = vadd.f32 %v3457_v40, %v3923_v22  ;;  %v3924_v26 = vld [vmem:[#allocation77_spill] sm:$0xff] }
 0x278   :  { %1954 = vmatpush.msrb.mxu1 %v1735_v59  ;;  %1963 = vmatpush.msrb.mxu2 %v1789_v19  ;;  %v1668_v6 = vadd.f32 %v3551_v29, %v3899_v18  ;;  %v1645_v59 = vadd.f32 %v3412_v3, %v3910_v37  ;;  %v3911_v19 = vld [vmem:[#allocation6_spill] sm:$0xff]  ;;  %v1643_v31 = vadd.f32 %v3433_v50, %v1131_v42  ;;  %v3913_v3 = vld [vmem:[#allocation91_spill] sm:$0xff]  ;;  %v3926_v39 = vld [vmem:[#allocation37_spill] sm:$0xff] }
 0x279   :  { %v1821_v45 = vmax.f32 %v3911_v19, 0.0  ;;  %v1685_v18 = vadd.f32 %v3914_v2, %v3913_v3  ;;  %v1671_v40 = vadd.f32 %v3513_v53, %v3926_v39  ;;  %v1830_v53 = vstv %s3629_s4 }
 0x27a   :  { %1955 = vmatpush.msrb.mxu1 %v1733_v8  ;;  %1964 = vmatpush.msrb.mxu2 %v1787_v14  ;;  %v1796_v54 = vmax.f32 %v1668_v6, 0.0  ;;  %v1775_v8 = vmax.f32 %v1647_v46, 0.0  ;;  %v479_v14 = vmul.f32 %v2442_v17, %v3891_v20  ;;  %v1641_v6 = vadd.f32 %v3498_v13, %v1129_v36  ;;  %v3919_v20 = vld [vmem:[#allocation28_spill] sm:$0xff]  ;;  %v3927_v46 = vld [vmem:[#allocation75_spill] sm:$0xff] }
 0x27b   :  { %1956 = vmatmul.f32.vlgmr.msrb.gmra.mxu1 %v1833_v21  ;;  %v1819_v21 = vmax.f32 %v3912_v51, 0.0  ;;  %v1773_v52 = vmax.f32 %v1645_v59, 0.0  ;;  %v1771_v17 = vmax.f32 %v1643_v31, 0.0  ;;  %v1681_v13 = vadd.f32 %v3921_v43, %v3920_v25 }
 0x27c   :  { %1965 = vmatpush.msrb.mxu2 %v1785_v30  ;;  %1915 = vmatpush.msra.mxu3 %v1796_v54  ;;  %v1125_v50 = vadd.f32 %v997_v28, %v479_v14  ;;  %v3918_v30 = vld [vmem:[#allocation60_spill] sm:$0xff]  ;;  %v1815_v54 = vmax.f32 %v3919_v20, 0.0  ;;  %v1769_v44 = vmax.f32 %v1641_v6, 0.0  ;;  %v1813_v60 = vmax.f32 %v1685_v18, 0.0 }
 0x27d   :  { %1916 = vmatmul.f32.vlgmr.msra.gmra.mxu3 %v1835_v49  ;;  %v1639_v55 = vadd.f32 %v3484_v16, %v3918_v30  ;;  %v1809_v61 = vmax.f32 %v1681_v13, 0.0  ;;  %v1799_v10 = vmax.f32 %v1671_v40, 0.0 }
 0x27e   :  { %1966 = vmatpush.msrb.mxu2 %v1783_v58  ;;  %1980 = vmatpush.msrb.mxu3 %v1827_v23  ;;  %v1637_v56 = vadd.f32 %v3496_v63, %v1125_v50  ;;  %v3922_v58 = vld [vmem:[#allocation87_spill] sm:$0xff]  ;;  %v1811_v23 = vmax.f32 %v1683_v27, 0.0  ;;  %v1675_v63 = vadd.f32 %v3467_v0, %v3924_v26 }
 0x27f   :  { %v1679_v5 = vadd.f32 %v3469_v1, %v3922_v58  ;;  %v1767_v16 = vmax.f32 %v1639_v55, 0.0  ;;  %v3925_v1 = vld [vmem:[#allocation83_spill] sm:$0xff] }
 0x280   :  { %1967 = vmatpush.msrb.mxu2 %v1781_v7  ;;  %1981 = vmatpush.msrb.mxu3 %v1825_v57  ;;  %v1765_v33 = vmax.f32 %v1637_v56, 0.0  ;;  %v1673_v15 = vadd.f32 %v3520_v11, %v3925_v1  ;;  %v1805_v57 = vmax.f32 %v1677_v24, 0.0  ;;  %v1803_v32 = vmax.f32 %v1675_v63, 0.0 }
 0x281   :  { %v1807_v7 = vmax.f32 %v1679_v5, 0.0 }
 0x282   :  { %1968 = vmatpush.msrb.mxu2 %v1779_v35  ;;  %1982 = vmatpush.msrb.mxu3 %v1823_v48  ;;  %v1669_v35 = vadd.f32 %v3551_v29, %v3927_v46  ;;  %v1801_v0 = vmax.f32 %v1673_v15, 0.0 }
 0x284   :  { %1969 = vmatpush.msrb.mxu2 %v1777_v62  ;;  %1983 = vmatpush.msrb.mxu3 %v1821_v45  ;;  %v1797_v48 = vmax.f32 %v1669_v35, 0.0 }
 0x286   :  { %1970 = vmatpush.msrb.mxu2 %v1775_v8  ;;  %1984 = vmatpush.msrb.mxu3 %v1819_v21  ;;  %v2006_v8 = vlaneseq }
 0x288   :  { %1971 = vmatpush.msrb.mxu2 %v1773_v52  ;;  %1985 = vmatpush.msrb.mxu3 %v1817_v47  ;;  %vm2008_vm1 = vcmp.lt.s32.totalorder %v2006_v8, 256 }
 0x28a   :  { %1972 = vmatpush.msrb.mxu2 %v1771_v17  ;;  %1986 = vmatpush.msrb.mxu3 %v1815_v54 }
 0x28c   :  { %1973 = vmatpush.msrb.mxu2 %v1769_v44  ;;  %1987 = vmatpush.msrb.mxu3 %v1813_v60 }
 0x28e   :  { %1974 = vmatpush.msrb.mxu2 %v1767_v16  ;;  %1988 = vmatpush.msrb.mxu3 %v1811_v23 }
 0x290   :  { %1975 = vmatpush.msrb.mxu2 %v1765_v33  ;;  %1989 = vmatpush.msrb.mxu3 %v1809_v61 }
 0x291   :  { %1976 = vmatmul.f32.vlgmr.msrb.gmra.mxu2 %v1834_v38 }
 0x292   :  { %1990 = vmatpush.msrb.mxu3 %v1807_v7 }
 0x294   :  { %1991 = vmatpush.msrb.mxu3 %v1805_v57 }
 0x296   :  { %1992 = vmatpush.msrb.mxu3 %v1803_v32 }
 0x298   :  { %1993 = vmatpush.msrb.mxu3 %v1801_v0 }
 0x29a   :  { %1994 = vmatpush.msrb.mxu3 %v1799_v10 }
 0x29c   :  { %1995 = vmatpush.msrb.mxu3 %v1797_v48 }
 0x29d   :  { %1996 = vmatmul.f32.vlgmr.msrb.gmra.mxu3 %v1835_v49 }
 0x2ea   :  { %v1857_v11 = vpop.f32.mrf.mxu0 }
 0x2eb   :  { %v1858_v62 = vadd.f32 %v1857_v11, %v1830_v53 }
 0x2ec   :  { %v1877_v38 = vpop.f32.mrf.mxu1 }
 0x2ed   :  { %v1878_v28 = vadd.f32 %v1877_v38, %v1858_v62 }
 0x2f2   :  { %v1937_v42 = vpop.f32.mrf.mxu0 }
 0x2f3   :  { %v1938_v37 = vadd.f32 %v1937_v42, %v1830_v53 }
 0x2f4   :  { %v1897_v9 = vpop.f32.mrf.mxu2 }
 0x2f5   :  { %v1898_v36 = vadd.f32 %v1897_v9, %v1878_v28 }
 0x2f8   :  { %v1957_v59 = vpop.f32.mrf.mxu1 }
 0x2f9   :  { %v1958_v19 = vadd.f32 %v1957_v59, %v1938_v37 }
 0x300   :  { %v1917_v29 = vpop.f32.mrf.mxu3 }
 0x301   :  { %v1918_v51 = vadd.f32 %v1917_v29, %v1898_v36 }
 0x314   :  { %v1977_v45 = vpop.f32.mrf.mxu2 }
 0x315   :  { %v1978_v31 = vadd.f32 %v1977_v45, %v1958_v19 }
 0x320   :  { %v1997_v41 = vpop.f32.mrf.mxu3 }
 0x321   :  { %v1998_v49 = vadd.f32 %v1997_v41, %v1978_v31 }
 0x323   :  { %v2002_v21 = vrot.slane %v1998_v49, 7 }
 0x325   :  { %v2004_v14 = vsel %vm2003_vm0, %v1918_v51, %v2002_v21 }
 0x326   :  { %2010 = vst.msk [vmem:[#allocation3] sm:$0x3] %vm2008_vm1, %v2004_v14 }
 0x327   :  { %2021 = dma.vmem_to_hbm [thread:$0]  %s2017_s18, 32, %s2019_s21, [#allocation4]  }
 0x328   :  { %2062 = dma.done.wait [#allocation4], 32  }
 0x329   :  { %2063 = vsyncadd [#allocation4], 4294967264 }
 0x32a   :  { %2026 = vsyncpa [#allocation4], 1 }

</bundles_post_ra>
